<compile_context>
chip_gen: v6e
topology: v6e:2x2x1
jax: 0.10.0
libtpu: 0.0.40
codegen_flags: <defaults>
</compile_context>

<pallas_src>
import functools
import math

import jax
import jax.numpy as jnp
import numpy as np
from jax import lax
from jax.experimental import pallas as pl
from jax.experimental.pallas import tpu as pltpu


def _round_up(x, m):
    return (x + m - 1) // m * m


def _default_block_q():
    # v6e's MXU is 2x256^2: 256-row query tiles fill it.  v5e (4x128^2 MXU)
    # and v7x (64 MiB VMEM) stay at 128.
    try:
        kind = jax.devices()[0].device_kind.lower()
        if "v6" in kind:
            return 256
    except Exception:
        pass
    return 128


def _pick_tq(N, block_q):
    """Largest multiple of 128 <= block_q that divides N, else N."""
    t = (min(block_q, N) // 128) * 128
    while t >= 128:
        if N % t == 0:
            return t
        t -= 128
    return N


def _vmem_limit_bytes(N, Cp, tq, feat_isz, attn_isz):
    est = (
        4 * N * Cp * feat_isz        # double-buffered K and V blocks
        + 2 * tq * Cp * feat_isz     # double-buffered x_q block
        + 2 * Cp * Cp * feat_isz     # resident Wq^T (conservatively x2)
        + 2 * Cp * 4                 # bias
        + 2 * Cp * tq * feat_isz     # double-buffered residual-output block
        + 2 * tq * N * attn_isz      # double-buffered attention-output block
        + 4 * tq * N * 4             # f32 softmax temporaries
        + 4 * tq * Cp * 4            # q / o temporaries
    )
    cap = 64 * 2**20                 # safe default (v7x physical VMEM)
    try:
        cap = int(pltpu.get_tpu_info().vmem_capacity_bytes * 0.8)
    except Exception:
        pass
    return int(min(max(int(est * 1.3), 32 * 2**20), cap))


def _self_attn_kernel(x_q_ref, k_ref, v_ref, wq_ref, bq_ref, gamma_ref,
                      out_ref, attn_ref, *, inv_sqrt_c):
    x_q = x_q_ref[0]                                              # (TQ, Cp), native dtype

    # Q projection on the MXU with f32 accumulation; fold 1/sqrt(C) into q
    # (TQ x Cp elementwise pass instead of TQ x N on the scores).
    q = (jnp.dot(x_q, wq_ref[...], preferred_element_type=jnp.float32)
         + bq_ref[0, :]) * jnp.float32(inv_sqrt_c)                # (TQ, Cp) f32

    # scores = q @ k^T: contract the channel dims directly (no transpose
    # materialized); MXU inputs stay in the feature's native dtype.
    scores = lax.dot_general(
        q.astype(x_q.dtype), k_ref[0],
        dimension_numbers=(((1,), (1,)), ((), ())),
        preferred_element_type=jnp.float32)                       # (TQ, N) f32

    # Row-wise stable softmax over all N keys; normalize via TQ reciprocals
    # plus a broadcast multiply (approx=True would push it to the EUP at the
    # cost of ~1e-4 relative error in the returned attention).
    m = jnp.max(scores, axis=-1, keepdims=True)
    p = jnp.exp(scores - m)
    inv = pl.reciprocal(jnp.sum(p, axis=-1, keepdims=True), approx=False)
    attn = p * inv                                                # (TQ, N) f32

    o = jnp.dot(attn.astype(v_ref.dtype), v_ref[0],
                preferred_element_type=jnp.float32)               # (TQ, Cp) f32

    gamma = gamma_ref[0, 0]
    res = gamma * o + x_q.astype(jnp.float32)                     # (TQ, Cp)

    # Store the residual output pre-transposed (C, TQ): lane dim = TQ (128-
    # multiple, lane-dense), XLU transpose rides an otherwise idle slot, and
    # the wrapper no longer needs a B*N*C transpose pass.
    out_ref[0] = res.T.astype(out_ref.dtype)
    attn_ref[0] = attn.astype(attn_ref.dtype)


def self_attn_propagation(feature, wq, bq, wk, bk, wv, bv, gamma, *,
                          block_q=None, attn_dtype=None):
    """feature: (B, C, H, W); wq/wk/wv: (C, C) PyTorch Linear weight (out, in);
    bq/bk/bv: (C,); gamma: scalar.  Returns (out (B,C,H,W), attention (B,N,N))."""
    B, C, H, W = feature.shape
    N = H * W
    dtype = feature.dtype
    attn_dtype = dtype if attn_dtype is None else attn_dtype
    block_q = _default_block_q() if block_q is None else block_q

    # Pad the channel dim to a multiple of 128 (lane-dense; exact math since
    # padded weight rows/cols and biases are zero).
    Cp = max(128, _round_up(C, 128))
    pad_c = Cp - C

    x = jnp.transpose(feature.reshape(B, C, N), (0, 2, 1))        # (B, N, C)
    if pad_c:
        x = jnp.pad(x, ((0, 0), (0, 0), (0, pad_c)))
        wq = jnp.pad(wq, ((0, pad_c), (0, pad_c)))
        wk = jnp.pad(wk, ((0, pad_c), (0, pad_c)))
        wv = jnp.pad(wv, ((0, pad_c), (0, pad_c)))
        bq = jnp.pad(bq, (0, pad_c))
        bk = jnp.pad(bk, (0, pad_c))
        bv = jnp.pad(bv, (0, pad_c))
    x = x.astype(dtype)

    wq_t = jnp.transpose(wq).astype(dtype)                        # (in, out)
    wk_t = jnp.transpose(wk)
    wv_t = jnp.transpose(wv)
    bq_r = bq.reshape(1, Cp).astype(jnp.float32)
    gamma_r = jnp.asarray(gamma, jnp.float32).reshape(1, 1)

    # K/V projections hoisted to XLA: removes the per-batch serial projection
    # bubble from the kernel and lets both grid axes be "parallel".
    k = (x.astype(jnp.float32) @ wk_t + bk).astype(dtype)         # (B, N, Cp)
    v = (x.astype(jnp.float32) @ wv_t + bv).astype(dtype)         # (B, N, Cp)

    tq = _pick_tq(N, block_q)
    n_q = N // tq

    vmem_limit = _vmem_limit_bytes(
        N, Cp, tq,
        feat_isz=jnp.dtype(dtype).itemsize,
        attn_isz=jnp.dtype(attn_dtype).itemsize)

    kernel = functools.partial(_self_attn_kernel,
                               inv_sqrt_c=float(1.0 / math.sqrt(C)))

    out_tokens, attention = pl.pallas_call(
        kernel,
        out_shape=(
            jax.ShapeDtypeStruct((B, Cp, N), dtype),
            jax.ShapeDtypeStruct((B, N, N), attn_dtype),
        ),
        grid=(B, n_q),
        in_specs=[
            # Query-row tile (pipelined per grid step).
            pl.BlockSpec((1, tq, Cp), lambda b, q: (b, q, 0)),
            # Full key/value set for this batch element (re-DMA'd only when b
            # changes since the block index is constant in q).
            pl.BlockSpec((1, N, Cp), lambda b, q: (b, 0, 0)),
            pl.BlockSpec((1, N, Cp), lambda b, q: (b, 0, 0)),
            pl.BlockSpec((Cp, Cp), lambda b, q: (0, 0)),          # Wq^T
            pl.BlockSpec((1, Cp), lambda b, q: (0, 0)),           # bq
            pl.BlockSpec(memory_space=pltpu.MemorySpace.SMEM),    # gamma
        ],
        out_specs=(
            pl.BlockSpec((1, Cp, tq), lambda b, q: (b, 0, q)),    # residual out (pre-transposed)
            pl.BlockSpec((1, tq, N), lambda b, q: (b, q, 0)),     # attention rows
        ),
        compiler_params=pltpu.CompilerParams(
            dimension_semantics=("parallel", "parallel"),
            vmem_limit_bytes=vmem_limit),
    )(x, k, v, wq_t, bq_r, gamma_r)

    out = out_tokens[:, :C, :].reshape(B, C, H, W)
    return out, attention


def _reference(feature, wq, bq, wk, bk, wv, bv, gamma):
    """Pure-JAX reference of the PyTorch forward."""
    B, C, H, W = feature.shape
    x = jnp.transpose(feature.reshape(B, C, H * W), (0, 2, 1))    # (B, N, C)
    q = x @ wq.T + bq
    k = x @ wk.T + bk
    v = x @ wv.T + bv
    scores = jnp.einsum('bnc,bmc->bnm', q, k) / math.sqrt(C)
    attn = jax.nn.softmax(scores, axis=-1)
    o = jnp.einsum('bnm,bmc->bnc', attn, v)
    out = gamma * jnp.transpose(o, (0, 2, 1)).reshape(B, C, H, W) + feature
    return out, attn


if __name__ == "__main__":
    B, C, H, W = 2, 4, 16, 16
    N = H * W
    key = jax.random.PRNGKey(0)
    kx, k1, k2, k3, k4, k5, k6 = jax.random.split(key, 7)

    feature = jax.random.normal(kx, (B, C, H, W), jnp.float32)

    # xavier_uniform for the (C, C) linear weights; default nn.Linear bias init.
    bound_w = float(np.sqrt(6.0 / (C + C)))
    bound_b = float(1.0 / np.sqrt(C))
    wq = jax.random.uniform(k1, (C, C), jnp.float32, -bound_w, bound_w)
    wk = jax.random.uniform(k2, (C, C), jnp.float32, -bound_w, bound_w)
    wv = jax.random.uniform(k3, (C, C), jnp.float32, -bound_w, bound_w)
    bq = jax.random.uniform(k4, (C,), jnp.float32, -bound_b, bound_b)
    bk = jax.random.uniform(k5, (C,), jnp.float32, -bound_b, bound_b)
    bv = jax.random.uniform(k6, (C,), jnp.float32, -bound_b, bound_b)
    # gamma is initialized to 0 in the module; use a nonzero value here so the
    # residual-scaling path is actually exercised by the test.
    gamma = jnp.float32(0.7)

    out, attn = jax.block_until_ready(
        self_attn_propagation(feature, wq, bq, wk, bk, wv, bv, gamma))
    ref_out, ref_attn = _reference(feature, wq, bq, wk, bk, wv, bv, gamma)

    assert out.shape == feature.shape and out.dtype == feature.dtype
    assert attn.shape == (B, N, N)
    np.testing.assert_allclose(np.asarray(out), np.asarray(ref_out),
                               rtol=1e-4, atol=1e-4)
    np.testing.assert_allclose(np.asarray(attn), np.asarray(ref_attn),
                               rtol=1e-4, atol=1e-4)
    print("KERNEL_OK")
</pallas_src>

<mosaic_0001>
module attributes {stable_mosaic.version = 11 : i64} {
  func.func @_self_attn_kernel(%arg0: i32, %arg1: i32, %arg2: memref<1x128x128xf32, #tpu.memory_space<vmem>>, %arg3: memref<1x256x128xf32, #tpu.memory_space<vmem>>, %arg4: memref<1x256x128xf32, #tpu.memory_space<vmem>>, %arg5: memref<128x128xf32, #tpu.memory_space<vmem>>, %arg6: memref<1x128xf32, #tpu.memory_space<vmem>>, %arg7: memref<1x1xf32, #tpu.memory_space<smem>>, %arg8: memref<1x128x128xf32, #tpu.memory_space<vmem>>, %arg9: memref<1x128x256xf32, #tpu.memory_space<vmem>>) attributes {dimension_semantics = [#tpu.dimension_semantics<parallel>, #tpu.dimension_semantics<parallel>], iteration_bounds = array<i64: 2, 2>, scalar_prefetch = 0 : i64, scratch_operands = 0 : i64, tpu.core_type = #tpu.core_type<tc>, window_params = [{transform_indices = @transform_0, window_bounds = array<i64: 1, 128, 128>}, {transform_indices = @transform_1, window_bounds = array<i64: 1, 256, 128>}, {transform_indices = @transform_2, window_bounds = array<i64: 1, 256, 128>}, {pipeline_mode = #tpu.pipeline_mode<synchronous>, transform_indices = @transform_3, window_bounds = array<i64: 128, 128>}, {pipeline_mode = #tpu.pipeline_mode<synchronous>, transform_indices = @transform_4, window_bounds = array<i64: 1, 128>}, {transform_indices = @transform_5, window_bounds = array<i64: 1, 1>}, {transform_indices = @transform_6, window_bounds = array<i64: 1, 128, 128>}, {transform_indices = @transform_7, window_bounds = array<i64: 1, 128, 256>}]} {
    %c0 = arith.constant 0 : index
    %c0_0 = arith.constant 0 : index
    %c0_1 = arith.constant 0 : index
    %0 = vector.load %arg2[%c0, %c0_0, %c0_1] : memref<1x128x128xf32, #tpu.memory_space<vmem>>, vector<1x128x128xf32>
    %1 = vector.shape_cast %0 : vector<1x128x128xf32> to vector<128x128xf32>
    %c0_2 = arith.constant 0 : index
    %c0_3 = arith.constant 0 : index
    %2 = vector.load %arg5[%c0_2, %c0_3] : memref<128x128xf32, #tpu.memory_space<vmem>>, vector<128x128xf32>
    %cst = arith.constant dense<0.000000e+00> : vector<128x128xf32>
    %3 = tpu.matmul %1, %2, %cst {dimension_numbers = #tpu.dot_dimension_numbers<[1], [0], [0], [1], [0, 0, 1, 1], [], []>} : vector<128x128xf32>, vector<128x128xf32>, vector<128x128xf32> -> vector<128x128xf32>
    %c0_4 = arith.constant 0 : index
    %c0_5 = arith.constant 0 : index
    %4 = vector.load %arg6[%c0_4, %c0_5] : memref<1x128xf32, #tpu.memory_space<vmem>>, vector<1x128xf32>
    %5 = vector.shape_cast %4 : vector<1x128xf32> to vector<128xf32>
    %6 = vector.shape_cast %5 : vector<128xf32> to vector<1x128xf32>
    %7 = vector.broadcast %6 : vector<1x128xf32> to vector<128x128xf32>
    %8 = arith.addf %3, %7 : vector<128x128xf32>
    %cst_6 = arith.constant 5.000000e-01 : f32
    %9 = vector.broadcast %cst_6 : f32 to vector<128x128xf32>
    %10 = arith.mulf %8, %9 : vector<128x128xf32>
    %c0_7 = arith.constant 0 : index
    %c0_8 = arith.constant 0 : index
    %c0_9 = arith.constant 0 : index
    %11 = vector.load %arg3[%c0_7, %c0_8, %c0_9] : memref<1x256x128xf32, #tpu.memory_space<vmem>>, vector<1x256x128xf32>
    %12 = vector.shape_cast %11 : vector<1x256x128xf32> to vector<256x128xf32>
    %cst_10 = arith.constant dense<0.000000e+00> : vector<128x256xf32>
    %13 = tpu.matmul %10, %12, %cst_10 {dimension_numbers = #tpu.dot_dimension_numbers<[1], [1], [0], [0], [0, 0, 1, 0], [], []>} : vector<128x128xf32>, vector<256x128xf32>, vector<128x256xf32> -> vector<128x256xf32>
    %cst_11 = arith.constant dense<0xFF800000> : vector<128xf32>
    %14 = vector.multi_reduction <maximumf>, %13, %cst_11 [1] : vector<128x256xf32> to vector<128xf32>
    %15 = vector.shape_cast %14 : vector<128xf32> to vector<128x1xf32>
    %16 = vector.broadcast %15 : vector<128x1xf32> to vector<128x256xf32>
    %17 = arith.subf %13, %16 : vector<128x256xf32>
    %18 = math.exp %17 : vector<128x256xf32>
    %cst_12 = arith.constant dense<0.000000e+00> : vector<128xf32>
    %19 = vector.multi_reduction <add>, %18, %cst_12 [1] : vector<128x256xf32> to vector<128xf32>
    %20 = vector.shape_cast %19 : vector<128xf32> to vector<128x1xf32>
    %21 = tpu.reciprocal %20 : vector<128x1xf32> -> vector<128x1xf32>
    %22 = vector.broadcast %21 : vector<128x1xf32> to vector<128x256xf32>
    %23 = arith.mulf %18, %22 : vector<128x256xf32>
    %c0_13 = arith.constant 0 : index
    %c0_14 = arith.constant 0 : index
    %c0_15 = arith.constant 0 : index
    %24 = vector.load %arg4[%c0_13, %c0_14, %c0_15] : memref<1x256x128xf32, #tpu.memory_space<vmem>>, vector<1x256x128xf32>
    %25 = vector.shape_cast %24 : vector<1x256x128xf32> to vector<256x128xf32>
    %cst_16 = arith.constant dense<0.000000e+00> : vector<128x128xf32>
    %26 = tpu.matmul %23, %25, %cst_16 {dimension_numbers = #tpu.dot_dimension_numbers<[1], [0], [0], [1], [0, 0, 1, 1], [], []>} : vector<128x256xf32>, vector<256x128xf32>, vector<128x128xf32> -> vector<128x128xf32>
    %c0_17 = arith.constant 0 : index
    %c0_18 = arith.constant 0 : index
    %27 = memref.load %arg7[%c0_17, %c0_18] : memref<1x1xf32, #tpu.memory_space<smem>>
    %28 = vector.broadcast %27 : f32 to vector<128x128xf32>
    %29 = arith.mulf %28, %26 : vector<128x128xf32>
    %30 = arith.addf %29, %1 : vector<128x128xf32>
    %31 = tpu.transpose %30, [1, 0] : vector<128x128xf32> -> vector<128x128xf32>
    %c0_19 = arith.constant 0 : index
    %c0_20 = arith.constant 0 : index
    %c0_21 = arith.constant 0 : index
    %32 = vector.load %arg8[%c0_19, %c0_20, %c0_21] : memref<1x128x128xf32, #tpu.memory_space<vmem>>, vector<1x128x128xf32>
    %33 = vector.shape_cast %32 : vector<1x128x128xf32> to vector<128x128xf32>
    %34 = vector.shape_cast %31 : vector<128x128xf32> to vector<1x128x128xf32>
    tpu.vector_store %arg8[%c0_19, %c0_20, %c0_21], %34 {strides = array<i32>} : memref<1x128x128xf32, #tpu.memory_space<vmem>>, vector<1x128x128xf32>,
    %c0_22 = arith.constant 0 : index
    %c0_23 = arith.constant 0 : index
    %c0_24 = arith.constant 0 : index
    %35 = vector.load %arg9[%c0_22, %c0_23, %c0_24] : memref<1x128x256xf32, #tpu.memory_space<vmem>>, vector<1x128x256xf32>
    %36 = vector.shape_cast %35 : vector<1x128x256xf32> to vector<128x256xf32>
    %37 = vector.shape_cast %23 : vector<128x256xf32> to vector<1x128x256xf32>
    tpu.vector_store %arg9[%c0_22, %c0_23, %c0_24], %37 {strides = array<i32>} : memref<1x128x256xf32, #tpu.memory_space<vmem>>, vector<1x128x256xf32>,
    return
  }
  func.func @transform_0(%arg0: i32, %arg1: i32) -> (i32, i32, i32) {
    %c0_i32 = arith.constant 0 : i32
    %c0_i32_0 = arith.constant 0 : i32
    return %arg0, %arg1, %c0_i32 : i32, i32, i32
  }
  func.func @transform_1(%arg0: i32, %arg1: i32) -> (i32, i32, i32) {
    %c0_i32 = arith.constant 0 : i32
    %c0_i32_0 = arith.constant 0 : i32
    %c0_i32_1 = arith.constant 0 : i32
    return %arg0, %c0_i32, %c0_i32_0 : i32, i32, i32
  }
  func.func @transform_2(%arg0: i32, %arg1: i32) -> (i32, i32, i32) {
    %c0_i32 = arith.constant 0 : i32
    %c0_i32_0 = arith.constant 0 : i32
    %c0_i32_1 = arith.constant 0 : i32
    return %arg0, %c0_i32, %c0_i32_0 : i32, i32, i32
  }
  func.func @transform_3(%arg0: i32, %arg1: i32) -> (i32, i32) {
    %c0_i32 = arith.constant 0 : i32
    %c0_i32_0 = arith.constant 0 : i32
    %c0_i32_1 = arith.constant 0 : i32
    return %c0_i32, %c0_i32_0 : i32, i32
  }
  func.func @transform_4(%arg0: i32, %arg1: i32) -> (i32, i32) {
    %c0_i32 = arith.constant 0 : i32
    %c0_i32_0 = arith.constant 0 : i32
    %c0_i32_1 = arith.constant 0 : i32
    return %c0_i32, %c0_i32_0 : i32, i32
  }
  func.func @transform_5(%arg0: i32, %arg1: i32) -> (i32, i32) {
    %c0_i32 = arith.constant 0 : i32
    %c0_i32_0 = arith.constant 0 : i32
    %c0_i32_1 = arith.constant 0 : i32
    return %c0_i32, %c0_i32_0 : i32, i32
  }
  func.func @transform_6(%arg0: i32, %arg1: i32) -> (i32, i32, i32) {
    %c0_i32 = arith.constant 0 : i32
    %c0_i32_0 = arith.constant 0 : i32
    return %arg0, %c0_i32, %arg1 : i32, i32, i32
  }
  func.func @transform_7(%arg0: i32, %arg1: i32) -> (i32, i32, i32) {
    %c0_i32 = arith.constant 0 : i32
    %c0_i32_0 = arith.constant 0 : i32
    return %arg0, %arg1, %c0_i32 : i32, i32, i32
  }
}

</mosaic_0001>

<bundles_post_ra>
// kernel: tpu_custom_call.1
= control target key start
LH: loop header
LB: loop body
LE: loop exit
PB: predicated region body
PF: predicated region fallthrough
CT: control target
= control target key end

     0   :  { %s3231_s0 = inlined_call_operand.hbm [shape: f32[2,256,128], index: 0, kind: input, shape index: {}]   ;;  %s3232_s1 = inlined_call_operand.hbm [shape: f32[2,256,128], index: 1, kind: input, shape index: {}]   ;;  %s3233_s2 = inlined_call_operand.hbm [shape: f32[2,256,128], index: 2, kind: input, shape index: {}]   ;;  %s3234_s3 = inlined_call_operand.hbm [shape: f32[128,128], index: 3, kind: input, shape index: {}]   ;;  %s3235_s4 = inlined_call_operand.vmem [shape: f32[1,128], index: 4, kind: input, shape index: {}]   ;;  %s3236_s5 = inlined_call_operand.<no memory space> [shape: f32[1,1], index: 5, kind: input, shape index: {}]   ;;  %s3237_s6 = inlined_call_operand.hbm [shape: f32[2,128,256], index: 6, kind: output, shape index: {0}]   ;;  %s3238_s7 = inlined_call_operand.hbm [shape: f32[2,256,256], index: 7, kind: output, shape index: {1}]  }
   0x1   :  { %3266 = sst [smem:[#allocation30_spill]] %s3232_s1 }
   0x2   :  { %3267 = sst [smem:[#allocation31_spill]] %s3233_s2 }
   0x3   :  { %3268 = sst [smem:[#allocation32_spill]] %s3234_s3 }
   0x4   :  { %3269 = sst [smem:[#allocation33_spill]] %s3235_s4 }
   0x5   :  { %3270 = sst [smem:[#allocation34_spill]] %s3237_s6 }
   0x6   :  { %3271 = sst [smem:[#allocation35_spill]] %s3238_s7 }
   0x7   :  { %13 = sst [smem:[#allocation2]] %s3236_s5 }
   0x8   :  { %14 = vsyncpa [#allocation4], 0 }
   0x9   :  { %16 = vsyncpa [#allocation4 + $0x1], 0 }
   0xa   :  { %17 = vsyncpa [#allocation7], 0 }
   0xb   :  { %19 = vsyncpa [#allocation7 + $0x1], 0 }
   0xc   :  { %20 = vsyncpa [#allocation10], 0 }
   0xd   :  { %21 = vsyncpa [#allocation5], 0 }
   0xe   :  { %23 = vsyncpa [#allocation5 + $0x1], 0 }
   0xf   :  { %24 = vsyncpa [#allocation13], 0 }
  0x10   :  { %26 = vsyncpa [#allocation13 + $0x1], 0  ;;  %s2402_s26 = smov 0   ;;  %s2404_s27 = smov 0  }
  0x11   :  { %s2406_s28 = smov 0   ;;  %s2408_s29 = smov 0  }
  0x12   :  { %s2410_s30 = smov 0   ;;  %s2412_s5 = smov 0  }
  0x13   :  { %s2414_s8 = smov 0   ;;  %s2416_s9 = smov 0  }
  0x14   :  { %s2418_s10 = smov 0   ;;  %s2420_s11 = smov 0  }
  0x15   :  { %s2422_s12 = smov 0  }
  0x16 LB: > { %3272 = sst [smem:[#allocation19_spill]] %s2309_s27  ;;  %p3245_p0 = scmp.eq.s32.totalorder %s2345_s12, 0  ;;  %s2345_s12 = sphi %s2422_s12, %s32_s12   ;;  %s2341_s11 = sphi %s2420_s11, %s3334_s11   ;;  %s2337_s10 = sphi %s2418_s10, %s3333_s10   ;;  %s2333_s9 = sphi %s2416_s9, %s3332_s9   ;;  %s2329_s8 = sphi %s2414_s8, %s3331_s8   ;;  %s2325_s5 = sphi %s2412_s5, %s3330_s5   ;;  %s2321_s30 = sphi %s2410_s30, %s3329_s30   ;;  %s2317_s29 = sphi %s2408_s29, %s3328_s29   ;;  %s2313_s28 = sphi %s2406_s28, %s3327_s28   ;;  %s2309_s27 = sphi %s2404_s27, %s3326_s27   ;;  %s2305_s26 = sphi %s2402_s26, %s3322_s26  }
  0x17   : > { %3273 = sst [smem:[#allocation20_spill]] %s2317_s29  ;;  %p86_p1 = scmp.ne.s32.totalorder %s2313_s28, %s2309_s27 }
  0x18   : > { %3274 = sst [smem:[#allocation21_spill]] %s2329_s8  ;;  %p3240_p3 = scmp.lt.s32.totalorder %s2345_s12, 4 }
  0x19   : > { %3275 = sst [smem:[#allocation22_spill]] %s2333_s9  ;;  %p88_p2 = por %p86_p1, %p3245_p0 }
  0x1a   : > { %3276 = sst [smem:[#allocation23_spill]] %s2337_s10  ;;  %s303_s15 = sand.u32 1, %s2345_s12  }
  0x1b   : > { %s305_s16 = sand.u32 1, %s2313_s28   ;;  %s1596_s18 = sshll.u32 %s2341_s11, 12 }
  0x1c   : > { %s2467_s17 = sshll.u32 %s305_s16, 8  ;;  %s3277_s1 = sld [smem:[#allocation30_spill]] }
  0x1d   : > { %s307_s22 = scalar_lea.vmem [#allocation6], %s2467_s17  ;;  %p2476_p4 = pnand %p3240_p3, %p88_p2 }
  0x1e   : > { %s314_s23 = sshll.u32 %s307_s22, 4  ;;  %s3279_s2 = sld [smem:[#allocation31_spill]]  ;;  %s315_s23 = int_to_ptr.vmem [resolvable:$true] %s314_s23 }
  0x1f   : > { %s2485_s13 = scalar_lea.sflag [#allocation7], %s303_s15  ;;  %p3239_p5 = pneg %p2476_p4 }
  0x20   : > { %s2090_s19 = scalar_lea.vmem %s315_s23, 4096  ;;  %s2347_s20 = smov [#allocation6]  }
  0x21   : > { %p2091_p6 = scmp.ne.s32.totalorder %s315_s23, %s2090_s19  ;;  %s2095_s22 = sshll.u32 %s2347_s20, 4  ;;  %s2096_s22 = int_to_ptr.vmem [resolvable:$false] %s2095_s22 }
  0x22   : > { %s313_s21 = scalar_lea.hbm %s3277_s1, %s1596_s18  ;;  %s2097_s1 = scalar_lea.vmem %s2096_s22, 8192 }
  0x23   : > { %p2093_p7 = pnand %p2091_p6, %p3239_p5  ;;  %p2098_p9 = scmp.lt.s32.totalorder %s315_s23, %s2096_s22 }
  0x24   : > { %s2483_s16 = scalar_lea.hbm %s3279_s2, %s1596_s18  ;;  %p2099_p10 = scmp.lt.s32.totalorder %s2097_s1, %s2090_s19 }
  0x25   : > { %p2094_p8 = pneg %p2093_p7 }
  0x26   : > { %p2100_p11 = por %p2099_p10, %p2098_p9 }
  0x28   : > { %p2101_p12 = pnand %p2100_p11, %p2094_p8 }
  0x2a   : > { %2104 = shalt.err (!%p2101_p12)
}
  0x2b   : > { %s3241_s14 = smov 128   ;;  %s3243_s15 = smov 8  }
  0x2c   : > { %1855 = dma.hbm_to_vmem [thread:$0]  (!%p2476_p4), %s313_s21, 4096, %s315_s23, %s2485_s13, %s3241_s14, %s3241_s14, %s3243_s15  }
  0x2d   : > { %s328_s1 = scalar_lea.vmem [#allocation8], %s2467_s17  ;;  %s2502_s25 = sadd.s32 4294967295, %s2345_s12  }
  0x2e   : > { %s335_s18 = sshll.u32 %s328_s1, 4  ;;  %3280 = sst [smem:[#allocation24_spill]] %s2502_s25  ;;  %s2499_s18 = int_to_ptr.vmem [resolvable:$true] %s335_s18 }
  0x2f   : > { %s1564_s19 = sadd.s32 4294967294, %s2345_s12   ;;  %p66_p13 = scmp.ne.s32.totalorder %s2321_s30, %s2317_s29 }
  0x30   : > { %p3247_p1 = scmp.eq.s32.totalorder %s2502_s25, 0  ;;  %p92_p2 = scmp.ne.s32.totalorder %s2309_s27, %s2305_s26 }
  0x31   : > { %p213_p8 = scmp.eq.s32.totalorder %s1564_s19, 3  ;;  %p1565_p10 = scmp.ge.s32.totalorder %s2345_s12, 1 }
  0x32   : > { %p2513_p7 = por %p3247_p1, %p66_p13  ;;  %p2519_p9 = por %p92_p2, %p3247_p1 }
  0x33   : > { %p2524_p11 = por %p213_p8, %p66_p13  ;;  %p248_p12 = scmp.lt.s32.totalorder %s2345_s12, 5 }
  0x34   : > { %s3282_s21 = scalar_select %p2519_p9, 1, 0 }
  0x35   : > { %s3284_s23 = scalar_select %p2524_p11, 1, 0 }
  0x36   : > { %3283 = sst [smem:[#allocation25_spill]] %s3282_s21  ;;  %p2529_p5 = pnand %p1565_p10, %p248_p12 }
  0x37   : > { %3285 = sst [smem:[#allocation26_spill]] %s3284_s23  ;;  %s2350_s20 = smov [#allocation9]  }
  0x38   : > { %s260_s22 = sshll.u32 %s2350_s20, 4  ;;  %p1845_p3 = pneg %p2529_p5  ;;  %s261_s22 = int_to_ptr.vmem [resolvable:$true] %s260_s22 }
  0x39   : > { %s41_s19 = sadd.s32 1, %s2337_s10  ;;  %p60_p8 = scmp.ne.s32.totalorder %s2325_s5, %s2321_s30 }
  0x3a   : > { %p2537_p2 = pnand %p1845_p3, %p3247_p1  ;;  %p2542_p13 = scmp.ge.s32.totalorder %s41_s19, 2 }
  0x3b   : > { %s2116_s2 = scalar_lea.vmem %s261_s22, 2048  ;;  %p2124_p11 = scmp.lt.s32.totalorder %s261_s22, %s261_s22 }
  0x3c   : > { %p2107_p10 = pneg %p2537_p2  ;;  %p2117_p12 = scmp.ne.s32.totalorder %s261_s22, %s2116_s2 }
  0x3d   : > { %p2125_p9 = scmp.lt.s32.totalorder %s2116_s2, %s2116_s2 }
  0x3e   : > { %p2119_p6 = pnand %p2117_p12, %p2107_p10 }
  0x3f   : > { %p2126_p3 = por %p2125_p9, %p2124_p11 }
  0x40   : > { %p2120_p0 = pneg %p2119_p6 }
  0x42   : > { %p2127_p1 = pnand %p2126_p3, %p2120_p0 }
  0x44   : > { %2130 = shalt.err (!%p2127_p1)
}
  0x45   : > { %s3289_s20 = smov 8   ;;  %s3290_s23 = smov 128  }
  0x46   : > { %s3291_s3 = sld [smem:[#allocation32_spill]]  ;;  %s3336_s19 = smov (%p2542_p13, %s41_s19), 0 }
  0x47   : > { %3292 = sst [smem:[#allocation27_spill]] %s3336_s19  ;;  %s3293_s2 = sadd.s32 1, %s2341_s11 }
  0x48   : > { %s3338_s2 = smov (!%p2542_p13, %s3293_s2), %s2341_s11  ;;  %s49_s6 = ssub.s32 %s2337_s10, %s3336_s19 }
  0x49   : > { %p3294_p0 = scmp.eq.s32.totalorder %s2345_s12, 0  ;;  %p46_p6 = scmp.ge.s32.totalorder %s3338_s2, 2 }
  0x4a   : > { %p3296_p9 = scmp.eq.s32.totalorder %s2502_s25, 3  ;;  %s3263_s1 = sand.u32 1, %s2325_s5  }
  0x4b   : > { %p2575_p1 = por %p3294_p0, %p60_p8  ;;  %s1569_s14 = sshll.u32 %s2337_s10, 4 }
  0x4c   : > { %1848 = dma.hbm_to_vmem [thread:$0]  (!%p2537_p2), %s3291_s3, 2048, %s261_s22, [#allocation10], %s3290_s23, %s3290_s23, %s3289_s20  }
  0x4d   : > { %p2584_p11 = por %p3296_p9, %p60_p8  ;;  %s3340_s2 = smov (%p46_p6, %s3338_s2), 0 }
  0x4e   : > { %3299 = sst [smem:[#allocation29_spill]] %s3340_s2  ;;  %s1568_s15 = sshll.u32 %s3263_s1, 7 }
  0x4f   : > { %s3297_s22 = scalar_select %p2584_p11, 1, 0 }
  0x50   : > { %s48_s3 = ssub.s32 %s2341_s11, %s3340_s2  ;;  %s1570_s7 = sshll.u32 %s2341_s11, 5 }
  0x51   : > { %3298 = sst [smem:[#allocation28_spill]] %s3297_s22  ;;  %s50_s19 = sor.u32 %s49_s6, %s48_s3 }
  0x52   : > { %p77_p2 = scmp.eq.s32.totalorder %s48_s3, 0  ;;  %p51_p13 = scmp.eq.s32.totalorder %s50_s19, 0 }
  0x53   : > { %s3300_s9 = sadd.s32 1, %s2313_s28  ;;  %s3301_s22 = sadd.s32 1, %s2325_s5 }
  0x54   : > { %s2600_s8 = scalar_select %p77_p2, %s2313_s28, %s3300_s9  }
  0x55   : > { %s2605_s10 = scalar_select %p51_p13, %s2325_s5, %s3301_s22  }
  0x56   : > { %s290_s4 = sadd.s32 %s1570_s7, %s1569_s14  ;;  %s284_s21 = scalar_lea.vmem [#allocation3], %s1568_s15 }
  0x57   : > { %s293_s27 = sshll.u32 %s284_s21, 4  ;;  %s1571_s25 = sshll.u32 %s290_s4, 7  ;;  %s2607_s27 = int_to_ptr.vmem [resolvable:$true] %s293_s27 }
  0x58   : > { %s2612_s6 = scalar_lea.hbm %s3231_s0, %s1571_s25  ;;  %p3302_p8 = scmp.lt.s32.totalorder %s2345_s12, 4 }
  0x59   : > { %s2144_s9 = scalar_lea.vmem %s2499_s18, 4096  ;;  %p3304_p3 = pneg %p2476_p4 }
  0x5a   : > { %p2618_p10 = pnand %p3302_p8, %p2575_p1  ;;  %p2145_p12 = scmp.ne.s32.totalorder %s2499_s18, %s2144_s9 }
  0x5b   : > { %s2351_s4 = smov [#allocation8]  }
  0x5c   : > { %p2147_p0 = pnand %p2145_p12, %p3304_p3  ;;  %s2149_s7 = sshll.u32 %s2351_s4, 4  ;;  %s2150_s7 = int_to_ptr.vmem [resolvable:$false] %s2149_s7 }
  0x5d   : > { %s2151_s15 = scalar_lea.vmem %s2150_s7, 8192  ;;  %p2152_p9 = scmp.lt.s32.totalorder %s2499_s18, %s2150_s7 }
  0x5e   : > { %p2148_p6 = pneg %p2147_p0  ;;  %p2153_p2 = scmp.lt.s32.totalorder %s2151_s15, %s2144_s9 }
  0x60   : > { %p2154_p13 = por %p2153_p2, %p2152_p9 }
  0x62   : > { %p2155_p11 = pnand %p2154_p13, %p2148_p6 }
  0x64   : > { %2158 = shalt.err (!%p2155_p11)
}
  0x65   : > { %1858 = dma.hbm_to_vmem [thread:$0]  (!%p2476_p4), %s2483_s16, 4096, %s2499_s18, %s2485_s13, %s3290_s23, %s3290_s23, %s3289_s20  }
  0x66   : > { %s3305_s25 = sand.u32 1, %s2325_s5   ;;  %p2161_p1 = pneg %p2618_p10 }
  0x67   : > { %s281_s21 = scalar_lea.sflag [#allocation4], %s3305_s25  ;;  %s2172_s19 = scalar_lea.vmem %s2607_s27, 2048 }
  0x68   : > { %p2173_p11 = scmp.ne.s32.totalorder %s2607_s27, %s2172_s19  ;;  %s2352_s24 = smov [#allocation3]  }
  0x69   : > { %s2177_s2 = sshll.u32 %s2352_s24, 4  ;;  %s2178_s2 = int_to_ptr.vmem [resolvable:$false] %s2177_s2 }
  0x6a   : > { %p2175_p8 = pnand %p2173_p11, %p2161_p1  ;;  %s2179_s29 = scalar_lea.vmem %s2178_s2, 4096 }
  0x6b   : > { %p2180_p3 = scmp.lt.s32.totalorder %s2607_s27, %s2178_s2  ;;  %p2181_p0 = scmp.lt.s32.totalorder %s2179_s29, %s2172_s19 }
  0x6c   : > { %p2176_p12 = pneg %p2175_p8 }
  0x6d   : > { %p2182_p6 = por %p2181_p0, %p2180_p3 }
  0x6f   : > { %p2183_p9 = pnand %p2182_p6, %p2176_p12 }
  0x71   : > { %2186 = shalt.err (!%p2183_p9)
}
  0x72   : > { %1852 = dma.hbm_to_vmem [thread:$0]  (!%p2618_p10), %s2612_s6, 2048, %s2607_s27, %s281_s21, %s3290_s23, %s3290_s23, %s3289_s20  }
  0x73   : > { %347 = sbr.rel (%p2529_p5) target bundleno = 1279 (0x4ff), region = 44  ;;  %s2653_s13 = sand.u32 (!%p2529_p5), 1, %s2321_s30  }
  0x74   : > { %s1579_s16 = sshll.u32 (!%p2529_p5), %s2653_s13, 7  ;;  %s350_s18 = scalar_lea.sflag (!%p2529_p5), [#allocation4], %s2653_s13 }
  0x75   : > { %s2659_s22 = scalar_lea.vmem (!%p2529_p5), [#allocation3], %s1579_s16 }
  0x78   : > { %2284 = dma.done.wait (%p2513_p7), %s350_s18, 2048  }
  0x79   : > { %2286 = vsyncadd (%p2513_p7), %s350_s18, 4294965248  ;;  %s3306_s27 = sld [smem:[#allocation24_spill]] }
  0x7a   : > { %s3307_s23 = sld [smem:[#allocation19_spill]] }
  0x7b   : > { %s3308_s26 = sld [smem:[#allocation25_spill]] }
  0x7f   : > { %s358_s20 = sand.u32 1, %s3306_s27  }
  0x80   : > { %s360_s1 = sand.u32 1, %s3307_s23   ;;  %s359_s6 = scalar_lea.sflag [#allocation7], %s358_s20 }
  0x81   : > { %s1580_s14 = sshll.u32 %s360_s1, 8  ;;  %p3309_p4 = scmp.ne.s32.totalorder %s3308_s26, 0 }
  0x82   : > { %s2667_s3 = scalar_lea.vmem [#allocation6], %s1580_s14 }
  0x83   : > { %2288 = dma.done.wait (%p3309_p4), %s359_s6, 8192  }
  0x84   : > { %2290 = vsyncadd (%p3309_p4), %s359_s6, 4294959104  ;;  %s2673_s9 = scalar_lea.vmem [#allocation8], %s1580_s14  ;;  %p3310_p5 = scmp.eq.s32.totalorder %s3306_s27, 0 }
  0x86   : > { %2292 = dma.done.wait (%p3310_p5), [#allocation10], 2048   ;;  %p3311_p7 = pmov %p3310_p5 }
  0x87   : > { %v454_v0 = vld [vmem:[#allocation9 + $0x78] sm:$0xff]  ;;  %v453_v1 = vld [vmem:[#allocation9 + $0x70] sm:$0xff]  ;;  %v452_v2 = vld [vmem:[#allocation9 + $0x68] sm:$0xff]  ;;  %s3312_s7 = sld [smem:[#allocation33_spill]]  ;;  %s1584_s15 = sshll.u32 %s2653_s13, 8 }
  0x88   : > { %2294 = vsyncadd (%p3311_p7), [#allocation10], 4294965248  ;;  %1775 = vmatprep.subr.mxu0 %v454_v0  ;;  %v451_v3 = vld [vmem:[#allocation9 + $0x60] sm:$0xff]  ;;  %v450_v5 = vld [vmem:[#allocation9 + $0x58] sm:$0xff]  ;;  %s3007_s25 = scalar_lea.vmem [#allocation12], %s1584_s15  ;;  %s1233_s21 = sld [smem:[#allocation2]] }
  0x89   : > { %1776 = vmatpush3.msra.mxu0 %v454_v0  ;;  %v423_v4 = vld [vmem:[%s2659_s22] sm:$0xff]  ;;  %v449_v6 = vld [vmem:[#allocation9 + $0x50] sm:$0xff]  ;;  %v448_v7 = vld [vmem:[#allocation9 + $0x48] sm:$0xff]  ;;  %s3313_s19 = sld [smem:[#allocation21_spill]]  ;;  %s1386_s26 = sshll.u32 %s3007_s25, 4  ;;  %s3113_s26 = int_to_ptr.vmem [resolvable:$true] %s1386_s26 }
  0x8a   : > { %1777 = vmatprep.subr.mxu0 %v453_v1  ;;  %1807 = vmatprep.mubr.f32.mxu0 %v423_v4  ;;  %v654_v8 = vld [vmem:[%s2667_s3 + $0xf8] sm:$0xff]  ;;  %v653_v10 = vld [vmem:[%s2667_s3 + $0xf0] sm:$0xff]  ;;  %v447_v11 = vld [vmem:[#allocation9 + $0x40] sm:$0xff]  ;;  %s3314_s24 = sld [smem:[#allocation22_spill]] }
  0x8b   : > { %1778 = vmatpush3.msra.mxu0 %v453_v1  ;;  %1631 = vmatprep.subr.mxu1 %v654_v8  ;;  %v638_v9 = vld [vmem:[%s2667_s3 + $0x78] sm:$0xff]  ;;  %v637_v12 = vld [vmem:[%s2667_s3 + $0x70] sm:$0xff]  ;;  %v652_v14 = vld [vmem:[%s2667_s3 + $0xe8] sm:$0xff]  ;;  %s3315_s2 = sld [smem:[#allocation28_spill]] }
  0x8c   : > { %1779 = vmatprep.subr.mxu0 %v452_v2  ;;  %1632 = vmatpush3.xpose.msra.mxu1 %v638_v9  ;;  %v446_v13 = vld [vmem:[#allocation9 + $0x38] sm:$0xff]  ;;  %v445_v15 = vld [vmem:[#allocation9 + $0x30] sm:$0xff]  ;;  %v636_v16 = vld [vmem:[%s2667_s3 + $0x68] sm:$0xff]  ;;  %s3316_s14 = sld [smem:[#allocation35_spill]] }
  0x8d   : > { %1780 = vmatpush3.msra.mxu0 %v452_v2  ;;  %1633 = vmatprep.subr.mxu1 %v653_v10  ;;  %v444_v17 = vld [vmem:[#allocation9 + $0x28] sm:$0xff]  ;;  %v651_v18 = vld [vmem:[%s2667_s3 + $0xe0] sm:$0xff]  ;;  %v442_v21 = vld [vmem:[#allocation9 + $0x18] sm:$0xff] }
  0x8e   : > { %1781 = vmatprep.subr.mxu0 %v451_v3  ;;  %v443_v19 = vld [vmem:[#allocation9 + $0x20] sm:$0xff]  ;;  %v650_v22 = vld [vmem:[%s2667_s3 + $0xd8] sm:$0xff]  ;;  %v441_v23 = vld [vmem:[#allocation9 + $0x10] sm:$0xff] }
  0x8f   : > { %1782 = vmatpush3.msra.mxu0 %v451_v3  ;;  %v635_v20 = vld [vmem:[%s2667_s3 + $0x60] sm:$0xff]  ;;  %v634_v24 = vld [vmem:[%s2667_s3 + $0x58] sm:$0xff]  ;;  %v440_v25 = vld [vmem:[#allocation9 + $0x8] sm:$0xff]  ;;  %s1598_s29 = sshll.u32 %s3313_s19, 5 }
  0x90   : > { %1783 = vmatprep.subr.mxu0 %v450_v5  ;;  %1634 = vmatpush3.xpose.msra.mxu1 %v637_v12  ;;  %v649_v26 = vld [vmem:[%s2667_s3 + $0xd0] sm:$0xff]  ;;  %v439_v27 = vld [vmem:[#allocation9] sm:$0xff]  ;;  %v424_v29 = vld [vmem:[%s2659_s22 + $0x8] sm:$0xff]  ;;  %s1592_s18 = sshll.u32 %s3314_s24, 6 }
  0x91   : > { %1784 = vmatpush3.msra.mxu0 %v450_v5  ;;  %1635 = vmatprep.subr.mxu1 %v652_v14  ;;  %v633_v28 = vld [vmem:[%s2667_s3 + $0x50] sm:$0xff]  ;;  %v648_v30 = vld [vmem:[%s2667_s3 + $0xc8] sm:$0xff]  ;;  %v426_v33 = vld [vmem:[%s2659_s22 + $0x18] sm:$0xff]  ;;  %s1383_s27 = sadd.s32 %s1598_s29, %s1592_s18  ;;  %p3317_p2 = scmp.ne.s32.totalorder %s3315_s2, 0 }
  0x92   : > { %1785 = vmatprep.subr.mxu0 %v449_v6  ;;  %v425_v31 = vld [vmem:[%s2659_s22 + $0x10] sm:$0xff]  ;;  %v632_v32 = vld [vmem:[%s2667_s3 + $0x48] sm:$0xff]  ;;  %v647_v34 = vld [vmem:[%s2667_s3 + $0xc0] sm:$0xff]  ;;  %s1593_s23 = sshll.u32 %s1383_s27, 7 }
  0x93   : > { %1786 = vmatpush3.msra.mxu0 %v449_v6  ;;  %v427_v35 = vld [vmem:[%s2659_s22 + $0x20] sm:$0xff]  ;;  %v428_v37 = vld [vmem:[%s2659_s22 + $0x28] sm:$0xff]  ;;  %v646_v38 = vld [vmem:[%s2667_s3 + $0xb8] sm:$0xff]  ;;  %s3111_s6 = scalar_lea.hbm %s3316_s14, %s1593_s23 }
  0x94   : > { %1787 = vmatprep.subr.mxu0 %v448_v7  ;;  %1636 = vmatpush3.xpose.msra.mxu1 %v636_v16  ;;  %v631_v36 = vld [vmem:[%s2667_s3 + $0x40] sm:$0xff]  ;;  %v429_v39 = vld [vmem:[%s2659_s22 + $0x30] sm:$0xff]  ;;  %v630_v40 = vld [vmem:[%s2667_s3 + $0x38] sm:$0xff] }
  0x95   : > { %1788 = vmatpush3.msra.mxu0 %v448_v7  ;;  %1637 = vmatprep.subr.mxu1 %v651_v18  ;;  %v430_v41 = vld [vmem:[%s2659_s22 + $0x38] sm:$0xff]  ;;  %v645_v42 = vld [vmem:[%s2667_s3 + $0xb0] sm:$0xff]  ;;  %v431_v43 = vld [vmem:[%s2659_s22 + $0x40] sm:$0xff] }
  0x96   : > { %1789 = vmatprep.subr.mxu0 %v447_v11  ;;  %v629_v44 = vld [vmem:[%s2667_s3 + $0x30] sm:$0xff]  ;;  %v432_v45 = vld [vmem:[%s2659_s22 + $0x48] sm:$0xff]  ;;  %v434_v49 = vld [vmem:[%s2659_s22 + $0x58] sm:$0xff] }
  0x97   : > { %1790 = vmatpush3.msra.mxu0 %v447_v11  ;;  %v644_v46 = vld [vmem:[%s2667_s3 + $0xa8] sm:$0xff]  ;;  %v433_v47 = vld [vmem:[%s2659_s22 + $0x50] sm:$0xff]  ;;  %v643_v50 = vld [vmem:[%s2667_s3 + $0xa0] sm:$0xff] }
  0x98   : > { %1791 = vmatprep.subr.mxu0 %v446_v13  ;;  %1638 = vmatpush3.xpose.msra.mxu1 %v635_v20  ;;  %v628_v48 = vld [vmem:[%s2667_s3 + $0x28] sm:$0xff]  ;;  %v435_v51 = vld [vmem:[%s2659_s22 + $0x60] sm:$0xff]  ;;  %v642_v54 = vld [vmem:[%s2667_s3 + $0x98] sm:$0xff] }
  0x99   : > { %1792 = vmatpush3.msra.mxu0 %v446_v13  ;;  %1639 = vmatprep.subr.mxu1 %v650_v22  ;;  %v627_v52 = vld [vmem:[%s2667_s3 + $0x20] sm:$0xff]  ;;  %v436_v53 = vld [vmem:[%s2659_s22 + $0x68] sm:$0xff]  ;;  %v437_v55 = vld [vmem:[%s2659_s22 + $0x70] sm:$0xff] }
  0x9a   : > { %1793 = vmatprep.subr.mxu0 %v445_v15  ;;  %v626_v56 = vld [vmem:[%s2667_s3 + $0x18] sm:$0xff]  ;;  %v641_v58 = vld [vmem:[%s2667_s3 + $0x90] sm:$0xff]  ;;  %v640_v60 = vld [vmem:[%s2667_s3 + $0x88] sm:$0xff] }
  0x9b   : > { %1794 = vmatpush3.msra.mxu0 %v445_v15  ;;  %v438_v57 = vld [vmem:[%s2659_s22 + $0x78] sm:$0xff]  ;;  %v625_v59 = vld [vmem:[%s2667_s3 + $0x10] sm:$0xff]  ;;  %v624_v61 = vld [vmem:[%s2667_s3 + $0x8] sm:$0xff] }
  0x9c   : > { %1795 = vmatprep.subr.mxu0 %v444_v17  ;;  %1640 = vmatpush3.xpose.msra.mxu1 %v634_v24  ;;  %v639_v62 = vld [vmem:[%s2667_s3 + $0x80] sm:$0xff] }
  0x9d   : > { %1796 = vmatpush3.msra.mxu0 %v444_v17  ;;  %1641 = vmatprep.subr.mxu1 %v649_v26  ;;  %v623_v63 = vld [vmem:[%s2667_s3] sm:$0xff]  ;;  %s1353_s3 = scalar_lea.sflag [#allocation13], %s2653_s13 }
  0x9e   : > { %1797 = vmatprep.subr.mxu0 %v443_v19  ;;  %v2730_v1 = vld [vmem:[%s3312_s7] ss:$0 sm:$0xff] }
  0x9f   : > { %1798 = vmatpush3.msra.mxu0 %v443_v19 }
  0xa0   : > { %1799 = vmatprep.subr.mxu0 %v442_v21  ;;  %1642 = vmatpush3.xpose.msra.mxu1 %v633_v28 }
  0xa1   : > { %1800 = vmatpush3.msra.mxu0 %v442_v21  ;;  %1643 = vmatprep.subr.mxu1 %v648_v30 }
  0xa2   : > { %1801 = vmatprep.subr.mxu0 %v441_v23 }
  0xa3   : > { %1802 = vmatpush3.msra.mxu0 %v441_v23 }
  0xa4   : > { %1803 = vmatprep.subr.mxu0 %v440_v25  ;;  %1644 = vmatpush3.xpose.msra.mxu1 %v632_v32 }
  0xa5   : > { %1804 = vmatpush3.msra.mxu0 %v440_v25  ;;  %1645 = vmatprep.subr.mxu1 %v647_v34 }
  0xa6   : > { %1805 = vmatprep.subr.mxu0 %v439_v27 }
  0xa7   : > { %1806 = vmatpush3.msra.mxu0 %v439_v27 }
  0xa8   : > { %1808 = vmatmul.mubr.f32.vlgmr.msra.gmra.mxu0 %v424_v29  ;;  %1646 = vmatpush3.xpose.msra.mxu1 %v631_v36 }
  0xa9   : > { %1810 = vmatprep.mubr.f32.mxu0 %v425_v31  ;;  %1647 = vmatprep.subr.mxu1 %v646_v38 }
  0xac   : > { %1811 = vmatmul.mubr.f32.gmra.mxu0 %v426_v33  ;;  %1648 = vmatpush3.xpose.msra.mxu1 %v630_v40 }
  0xad   : > { %1813 = vmatprep.mubr.f32.mxu0 %v427_v35  ;;  %1649 = vmatprep.subr.mxu1 %v645_v42 }
  0xb0   : > { %1814 = vmatmul.mubr.f32.gmra.mxu0 %v428_v37  ;;  %1650 = vmatpush3.xpose.msra.mxu1 %v629_v44 }
  0xb1   : > { %1816 = vmatprep.mubr.f32.mxu0 %v429_v39  ;;  %1651 = vmatprep.subr.mxu1 %v644_v46 }
  0xb4   : > { %1817 = vmatmul.mubr.f32.gmra.mxu0 %v430_v41  ;;  %1652 = vmatpush3.xpose.msra.mxu1 %v628_v48 }
  0xb5   : > { %1819 = vmatprep.mubr.f32.mxu0 %v431_v43  ;;  %1653 = vmatprep.subr.mxu1 %v643_v50 }
  0xb8   : > { %1820 = vmatmul.mubr.f32.gmra.mxu0 %v432_v45  ;;  %1654 = vmatpush3.xpose.msra.mxu1 %v627_v52 }
  0xb9   : > { %1822 = vmatprep.mubr.f32.mxu0 %v433_v47  ;;  %1655 = vmatprep.subr.mxu1 %v642_v54 }
  0xbc   : > { %1823 = vmatmul.mubr.f32.gmra.mxu0 %v434_v49  ;;  %1656 = vmatpush3.xpose.msra.mxu1 %v626_v56 }
  0xbd   : > { %1825 = vmatprep.mubr.f32.mxu0 %v435_v51  ;;  %1657 = vmatprep.subr.mxu1 %v641_v58 }
  0xc0   : > { %1826 = vmatmul.mubr.f32.gmra.mxu0 %v436_v53  ;;  %1658 = vmatpush3.xpose.msra.mxu1 %v625_v59 }
  0xc1   : > { %1828 = vmatprep.mubr.f32.mxu0 %v437_v55  ;;  %1659 = vmatprep.subr.mxu1 %v640_v60 }
  0xc4   : > { %1829 = vmatmul.mubr.f32.gmra.mxu0 %v438_v57  ;;  %1660 = vmatpush3.xpose.msra.mxu1 %v624_v61 }
  0xc5   : > { %1661 = vmatprep.subr.mxu1 %v639_v62 }
  0xc8   : > { %1662 = vmatpush3.xpose.msra.mxu1 %v623_v63 }
 0x168   : > { %v1809_v0 = vpop.f32.mrf.mxu0 }
 0x169   : > { %v534_v3 = vadd.f32 %v1809_v0, %v2730_v1 }
 0x16a   : > { %v528_v2 = vpop.f32.mrf.mxu0 }
 0x16b   : > { %v529_v4 = vadd.f32 %v2730_v1, %v528_v2  ;;  %v608_v8 = vmul.f32 0.5, %v534_v3 }
 0x16c   : > { %v1812_v5 = vpop.f32.mrf.mxu0 }
 0x16d   : > { %v607_v6 = vmul.f32 0.5, %v529_v4  ;;  %v544_v13 = vadd.f32 %v1812_v5, %v2730_v1 }
 0x16e   : > { %v538_v7 = vpop.f32.mrf.mxu0 }
 0x16f   : > { %1663 = vmatprep.mubr.f32.mxu1 %v607_v6  ;;  %v539_v9 = vadd.f32 %v2730_v1, %v538_v7  ;;  %v610_v16 = vmul.f32 0.5, %v544_v13 }
 0x170   : > { %1664 = vmatmul.mubr.f32.vlgmr.msra.gmra.mxu1 %v607_v6  ;;  %v1815_v10 = vpop.f32.mrf.mxu0 }
 0x171   : > { %v609_v11 = vmul.f32 0.5, %v539_v9  ;;  %1665 = vmatprep.mubr.f32.mxu1 %v608_v8  ;;  %v554_v19 = vadd.f32 %v1815_v10, %v2730_v1 }
 0x172   : > { %v548_v12 = vpop.f32.mrf.mxu0 }
 0x173   : > { %v549_v14 = vadd.f32 %v2730_v1, %v548_v12  ;;  %v612_v22 = vmul.f32 0.5, %v554_v19 }
 0x174   : > { %1666 = vmatmul.mubr.f32.gmra.mxu1 %v608_v8  ;;  %v1818_v15 = vpop.f32.mrf.mxu0 }
 0x175   : > { %1667 = vmatprep.mubr.f32.mxu1 %v609_v11  ;;  %v611_v17 = vmul.f32 0.5, %v549_v14  ;;  %v564_v25 = vadd.f32 %v1818_v15, %v2730_v1 }
 0x176   : > { %v558_v18 = vpop.f32.mrf.mxu0 }
 0x177   : > { %v559_v20 = vadd.f32 %v2730_v1, %v558_v18  ;;  %v614_v28 = vmul.f32 0.5, %v564_v25 }
 0x178   : > { %1668 = vmatmul.mubr.f32.gmra.mxu1 %v609_v11  ;;  %v1821_v21 = vpop.f32.mrf.mxu0 }
 0x179   : > { %1669 = vmatprep.mubr.f32.mxu1 %v610_v16  ;;  %v613_v23 = vmul.f32 0.5, %v559_v20  ;;  %v574_v31 = vadd.f32 %v1821_v21, %v2730_v1 }
 0x17a   : > { %v568_v24 = vpop.f32.mrf.mxu0 }
 0x17b   : > { %v569_v26 = vadd.f32 %v2730_v1, %v568_v24  ;;  %v616_v34 = vmul.f32 0.5, %v574_v31 }
 0x17c   : > { %1670 = vmatmul.mubr.f32.gmra.mxu1 %v610_v16  ;;  %v1824_v27 = vpop.f32.mrf.mxu0 }
 0x17d   : > { %1671 = vmatprep.mubr.f32.mxu1 %v611_v17  ;;  %v615_v29 = vmul.f32 0.5, %v569_v26  ;;  %v584_v37 = vadd.f32 %v1824_v27, %v2730_v1 }
 0x17e   : > { %v578_v30 = vpop.f32.mrf.mxu0 }
 0x17f   : > { %v579_v32 = vadd.f32 %v2730_v1, %v578_v30  ;;  %v618_v40 = vmul.f32 0.5, %v584_v37  ;;  %v1085_v37 = vld [vmem:[%s2673_s9 + $0xe8] sm:$0xff] }
 0x180   : > { %1672 = vmatmul.mubr.f32.gmra.mxu1 %v611_v17  ;;  %v1827_v33 = vpop.f32.mrf.mxu0 }
 0x181   : > { %1673 = vmatprep.mubr.f32.mxu1 %v612_v22  ;;  %v617_v35 = vmul.f32 0.5, %v579_v32  ;;  %v594_v43 = vadd.f32 %v1827_v33, %v2730_v1  ;;  %v1087_v33 = vld [vmem:[%s2673_s9 + $0xf8] sm:$0xff] }
 0x182   : > { %v588_v36 = vpop.f32.mrf.mxu0  ;;  %1695 = vmatprep.subr.mxu0 %v1087_v33 }
 0x183   : > { %v589_v38 = vadd.f32 %v2730_v1, %v588_v36  ;;  %v620_v45 = vmul.f32 0.5, %v594_v43  ;;  %v1070_v36 = vld [vmem:[%s2673_s9 + $0x70] sm:$0xff] }
 0x184   : > { %1674 = vmatmul.mubr.f32.gmra.mxu1 %v612_v22  ;;  %v1830_v39 = vpop.f32.mrf.mxu0  ;;  %v1082_v43 = vld [vmem:[%s2673_s9 + $0xd0] sm:$0xff] }
 0x185   : > { %1675 = vmatprep.mubr.f32.mxu1 %v613_v23  ;;  %v619_v41 = vmul.f32 0.5, %v589_v38  ;;  %v604_v47 = vadd.f32 %v1830_v39, %v2730_v1  ;;  %v1069_v38 = vld [vmem:[%s2673_s9 + $0x68] sm:$0xff]  ;;  %v1084_v39 = vld [vmem:[%s2673_s9 + $0xe0] sm:$0xff] }
 0x186   : > { %v598_v42 = vpop.f32.mrf.mxu0 }
 0x187   : > { %v599_v44 = vadd.f32 %v2730_v1, %v598_v42  ;;  %v622_v48 = vmul.f32 0.5, %v604_v47  ;;  %v1067_v42 = vld [vmem:[%s2673_s9 + $0x58] sm:$0xff]  ;;  %v1080_v47 = vld [vmem:[%s2673_s9 + $0xc0] sm:$0xff] }
 0x188   : > { %1676 = vmatmul.mubr.f32.gmra.mxu1 %v613_v23 }
 0x189   : > { %1677 = vmatprep.mubr.f32.mxu1 %v614_v28  ;;  %v621_v46 = vmul.f32 0.5, %v599_v44  ;;  %v1066_v44 = vld [vmem:[%s2673_s9 + $0x50] sm:$0xff] }
 0x18c   : > { %1678 = vmatmul.mubr.f32.gmra.mxu1 %v614_v28 }
 0x18d   : > { %1679 = vmatprep.mubr.f32.mxu1 %v615_v29 }
 0x190   : > { %1680 = vmatmul.mubr.f32.gmra.mxu1 %v615_v29 }
 0x191   : > { %1681 = vmatprep.mubr.f32.mxu1 %v616_v34 }
 0x194   : > { %1682 = vmatmul.mubr.f32.gmra.mxu1 %v616_v34  ;;  %v1071_v34 = vld [vmem:[%s2673_s9 + $0x78] sm:$0xff] }
 0x195   : > { %1683 = vmatprep.mubr.f32.mxu1 %v617_v35  ;;  %1696 = vmatpush3.msra.mxu0 %v1071_v34 }
 0x198   : > { %1684 = vmatmul.mubr.f32.gmra.mxu1 %v617_v35  ;;  %v1086_v35 = vld [vmem:[%s2673_s9 + $0xf0] sm:$0xff] }
 0x199   : > { %1685 = vmatprep.mubr.f32.mxu1 %v618_v40  ;;  %1697 = vmatprep.subr.mxu0 %v1086_v35 }
 0x19a   : > { %1698 = vmatpush3.msra.mxu0 %v1070_v36 }
 0x19b   : > { %1699 = vmatprep.subr.mxu0 %v1085_v37 }
 0x19c   : > { %1686 = vmatmul.mubr.f32.gmra.mxu1 %v618_v40  ;;  %v1068_v40 = vld [vmem:[%s2673_s9 + $0x60] sm:$0xff]  ;;  %1700 = vmatpush3.msra.mxu0 %v1069_v38 }
 0x19d   : > { %1687 = vmatprep.mubr.f32.mxu1 %v619_v41  ;;  %1701 = vmatprep.subr.mxu0 %v1084_v39 }
 0x19e   : > { %1702 = vmatpush3.msra.mxu0 %v1068_v40 }
 0x1a0   : > { %1688 = vmatmul.mubr.f32.gmra.mxu1 %v619_v41  ;;  %v1083_v41 = vld [vmem:[%s2673_s9 + $0xd8] sm:$0xff] }
 0x1a1   : > { %1689 = vmatprep.mubr.f32.mxu1 %v620_v45  ;;  %1703 = vmatprep.subr.mxu0 %v1083_v41 }
 0x1a2   : > { %1704 = vmatpush3.msra.mxu0 %v1067_v42 }
 0x1a3   : > { %1705 = vmatprep.subr.mxu0 %v1082_v43 }
 0x1a4   : > { %1690 = vmatmul.mubr.f32.gmra.mxu1 %v620_v45  ;;  %v1081_v45 = vld [vmem:[%s2673_s9 + $0xc8] sm:$0xff]  ;;  %1706 = vmatpush3.msra.mxu0 %v1066_v44 }
 0x1a5   : > { %1691 = vmatprep.mubr.f32.mxu1 %v621_v46  ;;  %1707 = vmatprep.subr.mxu0 %v1081_v45 }
 0x1a8   : > { %1692 = vmatmul.mubr.f32.gmra.mxu1 %v621_v46  ;;  %v1065_v46 = vld [vmem:[%s2673_s9 + $0x48] sm:$0xff] }
 0x1a9   : > { %1693 = vmatprep.mubr.f32.mxu1 %v622_v48  ;;  %1708 = vmatpush3.msra.mxu0 %v1065_v46 }
 0x1aa   : > { %1709 = vmatprep.subr.mxu0 %v1080_v47 }
 0x1ac   : > { %1694 = vmatmul.mubr.f32.gmra.mxu1 %v622_v48  ;;  %v1064_v48 = vld [vmem:[%s2673_s9 + $0x40] sm:$0xff] }
 0x1ad   : > { %1710 = vmatpush3.msra.mxu0 %v1064_v48 }
 0x230   : > { %v2748_v49 = vpop.f32.mrf.mxu1 }
 0x232   : > { %v2750_v50 = vpop.f32.mrf.mxu1 }
 0x233   : > { %v816_v51 = vmax.f32 %v2748_v49, %v2750_v50 }
 0x234   : > { %v2754_v52 = vpop.f32.mrf.mxu1 }
 0x235   : > { %817 = vmax.xlane.f32.xlu0 %v816_v51 }
 0x236   : > { %v2756_v53 = vpop.f32.mrf.mxu1 }
 0x237   : > { %v819_v54 = vmax.f32 %v2754_v52, %v2756_v53 }
 0x238   : > { %v2760_v55 = vpop.f32.mrf.mxu1 }
 0x239   : > { %820 = vmax.xlane.f32.xlu0 %v819_v54 }
 0x23a   : > { %v2762_v56 = vpop.f32.mrf.mxu1 }
 0x23b   : > { %v822_v57 = vmax.f32 %v2760_v55, %v2762_v56 }
 0x23c   : > { %v2766_v58 = vpop.f32.mrf.mxu1 }
 0x23d   : > { %823 = vmax.xlane.f32.xlu1 %v822_v57 }
 0x23e   : > { %v2768_v59 = vpop.f32.mrf.mxu1 }
 0x23f   : > { %v825_v60 = vmax.f32 %v2766_v58, %v2768_v59 }
 0x240   : > { %v2772_v61 = vpop.f32.mrf.mxu1 }
 0x241   : > { %826 = vmax.xlane.f32.xlu1 %v825_v60 }
 0x242   : > { %v2774_v62 = vpop.f32.mrf.mxu1 }
 0x243   : > { %v828_v63 = vmax.f32 %v2772_v61, %v2774_v62 }
 0x244   : > { %v2778_v0 = vpop.f32.mrf.mxu1 }
 0x245   : > { %829 = vmax.xlane.f32.xlu0 %v828_v63 }
 0x246   : > { %v2780_v1 = vpop.f32.mrf.mxu1 }
 0x247   : > { %v831_v2 = vmax.f32 %v2778_v0, %v2780_v1 }
 0x248   : > { %v2784_v3 = vpop.f32.mrf.mxu1 }
 0x249   : > { %832 = vmax.xlane.f32.xlu1 %v831_v2 }
 0x24a   : > { %v2786_v4 = vpop.f32.mrf.mxu1 }
 0x24b   : > { %v834_v5 = vmax.f32 %v2784_v3, %v2786_v4 }
 0x24c   : > { %v2790_v6 = vpop.f32.mrf.mxu1 }
 0x24d   : > { %835 = vmax.xlane.f32.xlu0 %v834_v5 }
 0x24e   : > { %v2792_v7 = vpop.f32.mrf.mxu1 }
 0x24f   : > { %v837_v8 = vmax.f32 %v2790_v6, %v2792_v7 }
 0x250   : > { %v2796_v9 = vpop.f32.mrf.mxu1 }
 0x251   : > { %838 = vmax.xlane.f32.xlu1 %v837_v8 }
 0x252   : > { %v2798_v10 = vpop.f32.mrf.mxu1 }
 0x253   : > { %v840_v11 = vmax.f32 %v2796_v9, %v2798_v10 }
 0x254   : > { %v2802_v12 = vpop.f32.mrf.mxu1 }
 0x255   : > { %841 = vmax.xlane.f32.xlu0 %v840_v11 }
 0x256   : > { %v2804_v13 = vpop.f32.mrf.mxu1 }
 0x257   : > { %v843_v14 = vmax.f32 %v2802_v12, %v2804_v13 }
 0x258   : > { %v2808_v15 = vpop.f32.mrf.mxu1 }
 0x259   : > { %844 = vmax.xlane.f32.xlu1 %v843_v14 }
 0x25a   : > { %v2810_v16 = vpop.f32.mrf.mxu1 }
 0x25b   : > { %v846_v17 = vmax.f32 %v2808_v15, %v2810_v16 }
 0x25c   : > { %v2814_v18 = vpop.f32.mrf.mxu1 }
 0x25d   : > { %847 = vmax.xlane.f32.xlu0 %v846_v17 }
 0x25e   : > { %v2816_v19 = vpop.f32.mrf.mxu1 }
 0x25f   : > { %v849_v20 = vmax.f32 %v2814_v18, %v2816_v19 }
 0x260   : > { %v2820_v21 = vpop.f32.mrf.mxu1 }
 0x261   : > { %850 = vmax.xlane.f32.xlu1 %v849_v20 }
 0x262   : > { %v2822_v22 = vpop.f32.mrf.mxu1 }
 0x263   : > { %v852_v23 = vmax.f32 %v2820_v21, %v2822_v22 }
 0x264   : > { %v2826_v24 = vpop.f32.mrf.mxu1 }
 0x265   : > { %853 = vmax.xlane.f32.xlu0 %v852_v23 }
 0x266   : > { %v2828_v25 = vpop.f32.mrf.mxu1 }
 0x267   : > { %v855_v26 = vmax.f32 %v2826_v24, %v2828_v25 }
 0x268   : > { %v2832_v27 = vpop.f32.mrf.mxu1 }
 0x269   : > { %856 = vmax.xlane.f32.xlu1 %v855_v26 }
 0x26a   : > { %v2834_v28 = vpop.f32.mrf.mxu1 }
 0x26b   : > { %v858_v29 = vmax.f32 %v2832_v27, %v2834_v28 }
 0x26c   : > { %v2838_v30 = vpop.f32.mrf.mxu1 }
 0x26d   : > { %859 = vmax.xlane.f32.xlu0 %v858_v29 }
 0x26e   : > { %v2840_v31 = vpop.f32.mrf.mxu1 }
 0x26f   : > { %v861_v32 = vmax.f32 %v2838_v30, %v2840_v31 }
 0x271   : > { %862 = vmax.xlane.f32.xlu1 %v861_v32 }
 0x2be   : > { %v818_v51 = vpop.xlane.xlu0 %817 }
 0x2bf   : > { %v864_v54 = vsub.f32 %v2748_v49, %v818_v51  ;;  %v865_v57 = vsub.f32 %v2750_v50, %v818_v51 }
 0x2c1   : > { %v896_v60 = vmul.f32 1.442695, %v864_v54  ;;  %v898_v63 = vmul.f32 1.442695, %v865_v57 }
 0x2c2   : > { %v821_v2 = vpop.xlane.xlu0 %820 }
 0x2c3   : > { %1965 = vpow2.f32 %v896_v60  ;;  %v866_v5 = vsub.f32 %v2754_v52, %v821_v2  ;;  %v867_v8 = vsub.f32 %v2756_v53, %v821_v2 }
 0x2c4   : > { %1967 = vpow2.f32 %v898_v63 }
 0x2c5   : > { %v900_v11 = vmul.f32 1.442695, %v866_v5  ;;  %v902_v14 = vmul.f32 1.442695, %v867_v8  ;;  %v1079_v8 = vld [vmem:[%s2673_s9 + $0xb8] sm:$0xff] }
 0x2c6   : > { %v824_v17 = vpop.xlane.xlu1 %823  ;;  %1711 = vmatprep.subr.mxu0 %v1079_v8 }
 0x2c7   : > { %1969 = vpow2.f32 %v900_v11  ;;  %v868_v20 = vsub.f32 %v2760_v55, %v824_v17  ;;  %v869_v23 = vsub.f32 %v2762_v56, %v824_v17  ;;  %v1063_v11 = vld [vmem:[%s2673_s9 + $0x38] sm:$0xff]  ;;  %v1062_v17 = vld [vmem:[%s2673_s9 + $0x30] sm:$0xff] }
 0x2c8   : > { %1971 = vpow2.f32 %v902_v14  ;;  %v1078_v14 = vld [vmem:[%s2673_s9 + $0xb0] sm:$0xff]  ;;  %1712 = vmatpush3.msra.mxu0 %v1063_v11 }
 0x2c9   : > { %v904_v49 = vmul.f32 1.442695, %v868_v20  ;;  %v906_v50 = vmul.f32 1.442695, %v869_v23  ;;  %1713 = vmatprep.subr.mxu0 %v1078_v14 }
 0x2ca   : > { %v827_v26 = vpop.xlane.xlu1 %826  ;;  %1714 = vmatpush3.msra.mxu0 %v1062_v17 }
 0x2cb   : > { %1973 = vpow2.f32 %v904_v49  ;;  %v870_v29 = vsub.f32 %v2766_v58, %v827_v26  ;;  %v871_v52 = vsub.f32 %v2768_v59, %v827_v26 }
 0x2cc   : > { %1975 = vpow2.f32 %v906_v50 }
 0x2cd   : > { %v908_v53 = vmul.f32 1.442695, %v870_v29  ;;  %v910_v32 = vmul.f32 1.442695, %v871_v52  ;;  %v1061_v29 = vld [vmem:[%s2673_s9 + $0x28] sm:$0xff]  ;;  %v1076_v52 = vld [vmem:[%s2673_s9 + $0xa0] sm:$0xff] }
 0x2ce   : > { %v830_v33 = vpop.xlane.xlu0 %829 }
 0x2cf   : > { %1977 = vpow2.f32 %v908_v53  ;;  %v872_v34 = vsub.f32 %v2772_v61, %v830_v33  ;;  %v873_v55 = vsub.f32 %v2774_v62, %v830_v33  ;;  %v1060_v33 = vld [vmem:[%s2673_s9 + $0x20] sm:$0xff] }
 0x2d0   : > { %v2870_v35 = vpop.eup %1965  ;;  %1979 = vpow2.f32 %v910_v32 }
 0x2d1   : > { %v2872_v56 = vpop.eup %1967  ;;  %v912_v36 = vmul.f32 1.442695, %v872_v34  ;;  %v914_v37 = vmul.f32 1.442695, %v873_v55 }
 0x2d2   : > { %v833_v38 = vpop.xlane.xlu1 %832  ;;  %v960_v58 = vadd.f32 %v2872_v56, %v2870_v35 }
 0x2d3   : > { %1981 = vpow2.f32 %v912_v36  ;;  %v874_v59 = vsub.f32 %v2778_v0, %v833_v38  ;;  %v875_v39 = vsub.f32 %v2780_v1, %v833_v38 }
 0x2d4   : > { %v2878_v40 = vpop.eup %1969  ;;  %1983 = vpow2.f32 %v914_v37  ;;  %961 = vadd.xlane.f32.xlu0 %v960_v58  ;;  %v1059_v58 = vld [vmem:[%s2673_s9 + $0x18] sm:$0xff] }
 0x2d5   : > { %v2880_v61 = vpop.eup %1971  ;;  %v916_v62 = vmul.f32 1.442695, %v874_v59  ;;  %v918_v41 = vmul.f32 1.442695, %v875_v39  ;;  %v1074_v59 = vld [vmem:[%s2673_s9 + $0x90] sm:$0xff] }
 0x2d6   : > { %v836_v42 = vpop.xlane.xlu0 %835  ;;  %v963_v43 = vadd.f32 %v2880_v61, %v2878_v40 }
 0x2d7   : > { %1985 = vpow2.f32 %v916_v62  ;;  %v876_v44 = vsub.f32 %v2784_v3, %v836_v42  ;;  %v877_v45 = vsub.f32 %v2786_v4, %v836_v42 }
 0x2d8   : > { %v2886_v0 = vpop.eup %1973  ;;  %1987 = vpow2.f32 %v918_v41  ;;  %964 = vadd.xlane.f32.xlu1 %v963_v43  ;;  %v1058_v41 = vld [vmem:[%s2673_s9 + $0x10] sm:$0xff] }
 0x2d9   : > { %v2888_v1 = vpop.eup %1975  ;;  %v920_v46 = vmul.f32 1.442695, %v876_v44  ;;  %v922_v47 = vmul.f32 1.442695, %v877_v45 }
 0x2da   : > { %v839_v48 = vpop.xlane.xlu1 %838  ;;  %v966_v51 = vadd.f32 %v2888_v1, %v2886_v0 }
 0x2db   : > { %1989 = vpow2.f32 %v920_v46  ;;  %v878_v3 = vsub.f32 %v2790_v6, %v839_v48  ;;  %v879_v4 = vsub.f32 %v2792_v7, %v839_v48  ;;  %v1072_v48 = vld [vmem:[%s2673_s9 + $0x80] sm:$0xff] }
 0x2dc   : > { %v2894_v54 = vpop.eup %1977  ;;  %1991 = vpow2.f32 %v922_v47  ;;  %967 = vadd.xlane.f32.xlu0 %v966_v51  ;;  %v1057_v47 = vld [vmem:[%s2673_s9 + $0x8] sm:$0xff] }
 0x2dd   : > { %v2896_v57 = vpop.eup %1979  ;;  %v924_v60 = vmul.f32 1.442695, %v878_v3  ;;  %v926_v63 = vmul.f32 1.442695, %v879_v4  ;;  %v1056_v4 = vld [vmem:[%s2673_s9] sm:$0xff] }
 0x2de   : > { %v842_v2 = vpop.xlane.xlu0 %841  ;;  %v969_v5 = vadd.f32 %v2896_v57, %v2894_v54 }
 0x2df   : > { %1993 = vpow2.f32 %v924_v60  ;;  %v880_v6 = vsub.f32 %v2796_v9, %v842_v2  ;;  %v881_v7 = vsub.f32 %v2798_v10, %v842_v2  ;;  %v1077_v10 = vld [vmem:[%s2673_s9 + $0xa8] sm:$0xff] }
 0x2e0   : > { %v2906_v20 = vpop.eup %1981  ;;  %1995 = vpow2.f32 %v926_v63  ;;  %970 = vadd.xlane.f32.xlu1 %v969_v5  ;;  %1715 = vmatprep.subr.mxu0 %v1077_v10 }
 0x2e1   : > { %v2908_v23 = vpop.eup %1983  ;;  %v928_v49 = vmul.f32 1.442695, %v880_v6  ;;  %v930_v50 = vmul.f32 1.442695, %v881_v7  ;;  %1716 = vmatpush3.msra.mxu0 %v1061_v29 }
 0x2e2   : > { %v845_v26 = vpop.xlane.xlu1 %844  ;;  %v972_v9 = vadd.f32 %v2908_v23, %v2906_v20  ;;  %1717 = vmatprep.subr.mxu0 %v1076_v52 }
 0x2e3   : > { %1997 = vpow2.f32 %v928_v49  ;;  %v882_v53 = vsub.f32 %v2802_v12, %v845_v26  ;;  %v883_v32 = vsub.f32 %v2804_v13, %v845_v26  ;;  %1718 = vmatpush3.msra.mxu0 %v1060_v33  ;;  %v1075_v13 = vld [vmem:[%s2673_s9 + $0x98] sm:$0xff] }
 0x2e4   : > { %v2918_v34 = vpop.eup %1985  ;;  %1999 = vpow2.f32 %v930_v50  ;;  %973 = vadd.xlane.f32.xlu0 %v972_v9  ;;  %1719 = vmatprep.subr.mxu0 %v1075_v13 }
 0x2e5   : > { %v2920_v55 = vpop.eup %1987  ;;  %v932_v36 = vmul.f32 1.442695, %v882_v53  ;;  %v934_v37 = vmul.f32 1.442695, %v883_v32  ;;  %1720 = vmatpush3.msra.mxu0 %v1059_v58 }
 0x2e6   : > { %v848_v38 = vpop.xlane.xlu0 %847  ;;  %v975_v12 = vadd.f32 %v2920_v55, %v2918_v34  ;;  %1721 = vmatprep.subr.mxu0 %v1074_v59 }
 0x2e7   : > { %2001 = vpow2.f32 %v932_v36  ;;  %v884_v39 = vsub.f32 %v2808_v15, %v848_v38  ;;  %v885_v62 = vsub.f32 %v2810_v16, %v848_v38  ;;  %1722 = vmatpush3.msra.mxu0 %v1058_v41  ;;  %v1073_v16 = vld [vmem:[%s2673_s9 + $0x88] sm:$0xff]  ;;  %s2187_s9 = scalar_lea.vmem %s3113_s26, 4096 }
 0x2e8   : > { %v2930_v42 = vpop.eup %1989  ;;  %2003 = vpow2.f32 %v934_v37  ;;  %976 = vadd.xlane.f32.xlu1 %v975_v12  ;;  %1723 = vmatprep.subr.mxu0 %v1073_v16  ;;  %p2188_p10 = scmp.ne.s32.totalorder %s3113_s26, %s2187_s9 }
 0x2e9   : > { %v2932_v43 = vpop.eup %1991  ;;  %v936_v44 = vmul.f32 1.442695, %v884_v39  ;;  %v938_v45 = vmul.f32 1.442695, %v885_v62  ;;  %1724 = vmatpush3.msra.mxu0 %v1057_v47 }
 0x2ea   : > { %v851_v46 = vpop.xlane.xlu1 %850  ;;  %v978_v15 = vadd.f32 %v2932_v43, %v2930_v42  ;;  %1725 = vmatprep.subr.mxu0 %v1072_v48  ;;  %p2189_p13 = pnand %p2188_p10, %p3317_p2 }
 0x2eb   : > { %2005 = vpow2.f32 %v936_v44  ;;  %v886_v51 = vsub.f32 %v2814_v18, %v851_v46  ;;  %v887_v3 = vsub.f32 %v2816_v19, %v851_v46  ;;  %1726 = vmatpush3.msra.mxu0 %v1056_v4 }
 0x2ec   : > { %v2942_v60 = vpop.eup %1993  ;;  %2007 = vpow2.f32 %v938_v45  ;;  %979 = vadd.xlane.f32.xlu0 %v978_v15  ;;  %p2190_p1 = pneg %p2189_p13 }
 0x2ed   : > { %v2944_v63 = vpop.eup %1995  ;;  %v940_v2 = vmul.f32 1.442695, %v886_v51  ;;  %v942_v5 = vmul.f32 1.442695, %v887_v3 }
 0x2ee   : > { %v854_v8 = vpop.xlane.xlu0 %853  ;;  %v981_v11 = vadd.f32 %v2944_v63, %v2942_v60 }
 0x2ef   : > { %2009 = vpow2.f32 %v940_v2  ;;  %v888_v18 = vsub.f32 %v2820_v21, %v854_v8  ;;  %v889_v19 = vsub.f32 %v2822_v22, %v854_v8 }
 0x2f0   : > { %v2950_v14 = vpop.eup %1997  ;;  %2011 = vpow2.f32 %v942_v5  ;;  %982 = vadd.xlane.f32.xlu1 %v981_v11 }
 0x2f1   : > { %v2952_v6 = vpop.eup %1999  ;;  %v944_v7 = vmul.f32 1.442695, %v888_v18  ;;  %v946_v17 = vmul.f32 1.442695, %v889_v19 }
 0x2f2   : > { %v857_v49 = vpop.xlane.xlu1 %856  ;;  %v984_v50 = vadd.f32 %v2952_v6, %v2950_v14 }
 0x2f3   : > { %2013 = vpow2.f32 %v944_v7  ;;  %v890_v26 = vsub.f32 %v2826_v24, %v857_v49  ;;  %v891_v9 = vsub.f32 %v2828_v25, %v857_v49 }
 0x2f4   : > { %v2958_v21 = vpop.eup %2001  ;;  %2015 = vpow2.f32 %v946_v17  ;;  %985 = vadd.xlane.f32.xlu0 %v984_v50 }
 0x2f5   : > { %v2960_v22 = vpop.eup %2003  ;;  %v948_v10 = vmul.f32 1.442695, %v890_v26  ;;  %v950_v29 = vmul.f32 1.442695, %v891_v9 }
 0x2f6   : > { %v860_v52 = vpop.xlane.xlu0 %859  ;;  %v987_v53 = vadd.f32 %v2960_v22, %v2958_v21 }
 0x2f7   : > { %2017 = vpow2.f32 %v948_v10  ;;  %v892_v32 = vsub.f32 %v2832_v27, %v860_v52  ;;  %v893_v33 = vsub.f32 %v2834_v28, %v860_v52 }
 0x2f8   : > { %v2966_v24 = vpop.eup %2005  ;;  %2019 = vpow2.f32 %v950_v29  ;;  %988 = vadd.xlane.f32.xlu1 %v987_v53 }
 0x2f9   : > { %v2968_v25 = vpop.eup %2007  ;;  %v952_v36 = vmul.f32 1.442695, %v892_v32  ;;  %v954_v37 = vmul.f32 1.442695, %v893_v33 }
 0x2fa   : > { %v863_v38 = vpop.xlane.xlu1 %862  ;;  %v990_v12 = vadd.f32 %v2968_v25, %v2966_v24 }
 0x2fb   : > { %2021 = vpow2.f32 %v952_v36  ;;  %v894_v13 = vsub.f32 %v2838_v30, %v863_v38  ;;  %v895_v58 = vsub.f32 %v2840_v31, %v863_v38 }
 0x2fc   : > { %v2974_v27 = vpop.eup %2009  ;;  %2023 = vpow2.f32 %v954_v37  ;;  %991 = vadd.xlane.f32.xlu0 %v990_v12 }
 0x2fd   : > { %v2976_v28 = vpop.eup %2011  ;;  %v956_v59 = vmul.f32 1.442695, %v894_v13  ;;  %v958_v39 = vmul.f32 1.442695, %v895_v58 }
 0x2fe   : > { %v993_v62 = vadd.f32 %v2976_v28, %v2974_v27 }
 0x2ff   : > { %2025 = vpow2.f32 %v956_v59 }
 0x300   : > { %v2980_v41 = vpop.eup %2013  ;;  %2027 = vpow2.f32 %v958_v39  ;;  %994 = vadd.xlane.f32.xlu1 %v993_v62 }
 0x301   : > { %v2982_v44 = vpop.eup %2015 }
 0x302   : > { %v996_v30 = vadd.f32 %v2982_v44, %v2980_v41 }
 0x304   : > { %v2986_v31 = vpop.eup %2017  ;;  %997 = vadd.xlane.f32.xlu0 %v996_v30 }
 0x305   : > { %v2988_v45 = vpop.eup %2019 }
 0x306   : > { %v999_v46 = vadd.f32 %v2988_v45, %v2986_v31 }
 0x308   : > { %v2992_v15 = vpop.eup %2021  ;;  %1000 = vadd.xlane.f32.xlu1 %v999_v46 }
 0x309   : > { %v2994_v16 = vpop.eup %2023 }
 0x30a   : > { %v1002_v47 = vadd.f32 %v2994_v16, %v2992_v15 }
 0x30c   : > { %v2998_v48 = vpop.eup %2025  ;;  %1003 = vadd.xlane.f32.xlu0 %v1002_v47 }
 0x30d   : > { %v3000_v51 = vpop.eup %2027 }
 0x30e   : > { %v1005_v3 = vadd.f32 %v3000_v51, %v2998_v48 }
 0x310   : > { %1006 = vadd.xlane.f32.xlu1 %v1005_v3 }
 0x35d   : > { %v962_v4 = vpop.xlane.xlu0 %961 }
 0x35e   : > { %2029 = vrcp.f32 %v962_v4 }
 0x361   : > { %v965_v2 = vpop.xlane.xlu1 %964 }
 0x362   : > { %2031 = vrcp.f32 %v965_v2 }
 0x365   : > { %v968_v5 = vpop.xlane.xlu0 %967 }
 0x366   : > { %2033 = vrcp.f32 %v968_v5 }
 0x369   : > { %v971_v8 = vpop.xlane.xlu1 %970 }
 0x36a   : > { %2035 = vrcp.f32 %v971_v8 }
 0x36b   : > { %v2030_v11 = vpop.eup %2029 }
 0x36c   : > { %v1025_v18 = vmul.f32 %v2030_v11, %v2872_v56  ;;  %v1024_v19 = vmul.f32 %v2030_v11, %v2870_v35 }
 0x36d   : > { %v974_v7 = vpop.xlane.xlu0 %973 }
 0x36e   : > { %2037 = vrcp.f32 %v974_v7  ;;  %1152 = vmatprep.mubr.f32.mxu0 %v1025_v18  ;;  %1316 = vst [vmem:[%s3007_s25 + $0x8] sm:$0xff] %v1025_v18  ;;  %1315 = vst [vmem:[%s3007_s25] sm:$0xff] %v1024_v19  ;;  %v3071_v18 = vstv %s1233_s21 }
 0x36f   : > { %v2032_v17 = vpop.eup %2031  ;;  %1153 = vmatmul.mubr.f32.vlgmr.msra.gmra.mxu0 %v1024_v19 }
 0x370   : > { %v1027_v49 = vmul.f32 %v2032_v17, %v2880_v61  ;;  %v1026_v56 = vmul.f32 %v2032_v17, %v2878_v40 }
 0x371   : > { %v977_v35 = vpop.xlane.xlu1 %976 }
 0x372   : > { %2039 = vrcp.f32 %v977_v35  ;;  %1157 = vmatprep.mubr.f32.mxu0 %v1027_v49  ;;  %1318 = vst [vmem:[%s3007_s25 + $0x18] sm:$0xff] %v1027_v49  ;;  %1317 = vst [vmem:[%s3007_s25 + $0x10] sm:$0xff] %v1026_v56 }
 0x373   : > { %v2034_v50 = vpop.eup %2033  ;;  %1158 = vmatmul.mubr.f32.gmra.mxu0 %v1026_v56 }
 0x374   : > { %v1029_v26 = vmul.f32 %v2034_v50, %v2888_v1  ;;  %v1028_v9 = vmul.f32 %v2034_v50, %v2886_v0 }
 0x375   : > { %v980_v10 = vpop.xlane.xlu0 %979 }
 0x376   : > { %2041 = vrcp.f32 %v980_v10  ;;  %1162 = vmatprep.mubr.f32.mxu0 %v1029_v26  ;;  %1320 = vst [vmem:[%s3007_s25 + $0x28] sm:$0xff] %v1029_v26  ;;  %1319 = vst [vmem:[%s3007_s25 + $0x20] sm:$0xff] %v1028_v9 }
 0x377   : > { %v2036_v61 = vpop.eup %2035  ;;  %1163 = vmatmul.mubr.f32.gmra.mxu0 %v1028_v9  ;;  %v2062_v9 = vld [vmem:[%s2659_s22 + $0x8] sm:$0xff] }
 0x378   : > { %v1031_v40 = vmul.f32 %v2036_v61, %v2896_v57  ;;  %v1030_v29 = vmul.f32 %v2036_v61, %v2894_v54 }
 0x379   : > { %v983_v52 = vpop.xlane.xlu1 %982 }
 0x37a   : > { %2043 = vrcp.f32 %v983_v52  ;;  %1167 = vmatprep.mubr.f32.mxu0 %v1031_v40  ;;  %1322 = vst [vmem:[%s3007_s25 + $0x38] sm:$0xff] %v1031_v40  ;;  %1321 = vst [vmem:[%s3007_s25 + $0x30] sm:$0xff] %v1030_v29 }
 0x37b   : > { %v2038_v1 = vpop.eup %2037  ;;  %1168 = vmatmul.mubr.f32.gmra.mxu0 %v1030_v29 }
 0x37c   : > { %v1033_v0 = vmul.f32 %v2038_v1, %v2908_v23  ;;  %v1032_v53 = vmul.f32 %v2038_v1, %v2906_v20  ;;  %v2063_v1 = vld [vmem:[%s2659_s22 + $0x10] sm:$0xff] }
 0x37d   : > { %v986_v32 = vpop.xlane.xlu0 %985 }
 0x37e   : > { %2045 = vrcp.f32 %v986_v32  ;;  %1172 = vmatprep.mubr.f32.mxu0 %v1033_v0  ;;  %1324 = vst [vmem:[%s3007_s25 + $0x48] sm:$0xff] %v1033_v0  ;;  %1323 = vst [vmem:[%s3007_s25 + $0x40] sm:$0xff] %v1032_v53 }
 0x37f   : > { %v2040_v57 = vpop.eup %2039  ;;  %1173 = vmatmul.mubr.f32.gmra.mxu0 %v1032_v53 }
 0x380   : > { %v1035_v54 = vmul.f32 %v2040_v57, %v2920_v55  ;;  %v1034_v33 = vmul.f32 %v2040_v57, %v2918_v34 }
 0x381   : > { %v989_v36 = vpop.xlane.xlu1 %988 }
 0x382   : > { %2047 = vrcp.f32 %v989_v36  ;;  %1177 = vmatprep.mubr.f32.mxu0 %v1035_v54  ;;  %1326 = vst [vmem:[%s3007_s25 + $0x58] sm:$0xff] %v1035_v54  ;;  %1325 = vst [vmem:[%s3007_s25 + $0x50] sm:$0xff] %v1034_v33 }
 0x383   : > { %v2042_v23 = vpop.eup %2041  ;;  %1178 = vmatmul.mubr.f32.gmra.mxu0 %v1034_v33  ;;  %v2064_v33 = vld [vmem:[%s2659_s22 + $0x18] sm:$0xff] }
 0x384   : > { %v1037_v20 = vmul.f32 %v2042_v23, %v2932_v43  ;;  %v1036_v37 = vmul.f32 %v2042_v23, %v2930_v42 }
 0x385   : > { %v992_v38 = vpop.xlane.xlu0 %991 }
 0x386   : > { %2049 = vrcp.f32 %v992_v38  ;;  %1182 = vmatprep.mubr.f32.mxu0 %v1037_v20  ;;  %1328 = vst [vmem:[%s3007_s25 + $0x68] sm:$0xff] %v1037_v20  ;;  %1327 = vst [vmem:[%s3007_s25 + $0x60] sm:$0xff] %v1036_v37 }
 0x387   : > { %v2044_v55 = vpop.eup %2043  ;;  %1183 = vmatmul.mubr.f32.gmra.mxu0 %v1036_v37 }
 0x388   : > { %v1039_v34 = vmul.f32 %v2044_v55, %v2944_v63  ;;  %v1038_v12 = vmul.f32 %v2044_v55, %v2942_v60  ;;  %v2065_v55 = vld [vmem:[%s2659_s22 + $0x20] sm:$0xff] }
 0x389   : > { %v995_v13 = vpop.xlane.xlu1 %994 }
 0x38a   : > { %2051 = vrcp.f32 %v995_v13  ;;  %1187 = vmatprep.mubr.f32.mxu0 %v1039_v34  ;;  %1330 = vst [vmem:[%s3007_s25 + $0x78] sm:$0xff] %v1039_v34  ;;  %1329 = vst [vmem:[%s3007_s25 + $0x70] sm:$0xff] %v1038_v12 }
 0x38b   : > { %v2046_v43 = vpop.eup %2045  ;;  %1188 = vmatmul.mubr.f32.gmra.mxu0 %v1038_v12 }
 0x38c   : > { %v1041_v42 = vmul.f32 %v2046_v43, %v2952_v6  ;;  %v1040_v58 = vmul.f32 %v2046_v43, %v2950_v14 }
 0x38d   : > { %v998_v59 = vpop.xlane.xlu0 %997 }
 0x38e   : > { %2053 = vrcp.f32 %v998_v59  ;;  %1192 = vmatprep.mubr.f32.mxu0 %v1041_v42  ;;  %1332 = vst [vmem:[%s3007_s25 + $0x88] sm:$0xff] %v1041_v42  ;;  %1331 = vst [vmem:[%s3007_s25 + $0x80] sm:$0xff] %v1040_v58 }
 0x38f   : > { %v2048_v63 = vpop.eup %2047  ;;  %1193 = vmatmul.mubr.f32.gmra.mxu0 %v1040_v58  ;;  %v2066_v58 = vld [vmem:[%s2659_s22 + $0x28] sm:$0xff] }
 0x390   : > { %v1043_v60 = vmul.f32 %v2048_v63, %v2960_v22  ;;  %v1042_v39 = vmul.f32 %v2048_v63, %v2958_v21 }
 0x391   : > { %v1001_v62 = vpop.xlane.xlu1 %1000 }
 0x392   : > { %2055 = vrcp.f32 %v1001_v62  ;;  %1197 = vmatprep.mubr.f32.mxu0 %v1043_v60  ;;  %1334 = vst [vmem:[%s3007_s25 + $0x98] sm:$0xff] %v1043_v60  ;;  %1333 = vst [vmem:[%s3007_s25 + $0x90] sm:$0xff] %v1042_v39 }
 0x393   : > { %v2050_v6 = vpop.eup %2049  ;;  %1198 = vmatmul.mubr.f32.gmra.mxu0 %v1042_v39 }
 0x394   : > { %v1045_v14 = vmul.f32 %v2050_v6, %v2968_v25  ;;  %v1044_v30 = vmul.f32 %v2050_v6, %v2966_v24  ;;  %v2067_v6 = vld [vmem:[%s2659_s22 + $0x30] sm:$0xff] }
 0x395   : > { %v1004_v46 = vpop.xlane.xlu0 %1003 }
 0x396   : > { %2057 = vrcp.f32 %v1004_v46  ;;  %1202 = vmatprep.mubr.f32.mxu0 %v1045_v14  ;;  %1336 = vst [vmem:[%s3007_s25 + $0xa8] sm:$0xff] %v1045_v14  ;;  %1335 = vst [vmem:[%s3007_s25 + $0xa0] sm:$0xff] %v1044_v30 }
 0x397   : > { %v2052_v21 = vpop.eup %2051  ;;  %1203 = vmatmul.mubr.f32.gmra.mxu0 %v1044_v30 }
 0x398   : > { %v1047_v22 = vmul.f32 %v2052_v21, %v2976_v28  ;;  %v1046_v47 = vmul.f32 %v2052_v21, %v2974_v27 }
 0x399   : > { %v1007_v3 = vpop.xlane.xlu1 %1006 }
 0x39a   : > { %2059 = vrcp.f32 %v1007_v3  ;;  %1207 = vmatprep.mubr.f32.mxu0 %v1047_v22  ;;  %1338 = vst [vmem:[%s3007_s25 + $0xb8] sm:$0xff] %v1047_v22  ;;  %1337 = vst [vmem:[%s3007_s25 + $0xb0] sm:$0xff] %v1046_v47 }
 0x39b   : > { %v2054_v24 = vpop.eup %2053  ;;  %1208 = vmatmul.mubr.f32.gmra.mxu0 %v1046_v47  ;;  %v2068_v47 = vld [vmem:[%s2659_s22 + $0x38] sm:$0xff] }
 0x39c   : > { %v1049_v25 = vmul.f32 %v2054_v24, %v2982_v44  ;;  %v1048_v4 = vmul.f32 %v2054_v24, %v2980_v41 }
 0x39e   : > { %1212 = vmatprep.mubr.f32.mxu0 %v1049_v25  ;;  %1340 = vst [vmem:[%s3007_s25 + $0xc8] sm:$0xff] %v1049_v25  ;;  %1339 = vst [vmem:[%s3007_s25 + $0xc0] sm:$0xff] %v1048_v4 }
 0x39f   : > { %v2056_v28 = vpop.eup %2055  ;;  %1213 = vmatmul.mubr.f32.gmra.mxu0 %v1048_v4 }
 0x3a0   : > { %v1051_v27 = vmul.f32 %v2056_v28, %v2988_v45  ;;  %v1050_v2 = vmul.f32 %v2056_v28, %v2986_v31 }
 0x3a2   : > { %1217 = vmatprep.mubr.f32.mxu0 %v1051_v27  ;;  %1342 = vst [vmem:[%s3007_s25 + $0xd8] sm:$0xff] %v1051_v27  ;;  %1341 = vst [vmem:[%s3007_s25 + $0xd0] sm:$0xff] %v1050_v2  ;;  %v2069_v27 = vld [vmem:[%s2659_s22 + $0x40] sm:$0xff] }
 0x3a3   : > { %v2058_v5 = vpop.eup %2057  ;;  %1218 = vmatmul.mubr.f32.gmra.mxu0 %v1050_v2 }
 0x3a4   : > { %v1053_v41 = vmul.f32 %v2058_v5, %v2994_v16  ;;  %v1052_v44 = vmul.f32 %v2058_v5, %v2992_v15 }
 0x3a6   : > { %1222 = vmatprep.mubr.f32.mxu0 %v1053_v41  ;;  %1344 = vst [vmem:[%s3007_s25 + $0xe8] sm:$0xff] %v1053_v41  ;;  %1343 = vst [vmem:[%s3007_s25 + $0xe0] sm:$0xff] %v1052_v44 }
 0x3a7   : > { %v2060_v8 = vpop.eup %2059  ;;  %1223 = vmatmul.mubr.f32.gmra.mxu0 %v1052_v44 }
 0x3a8   : > { %v1055_v45 = vmul.f32 %v2060_v8, %v3000_v51  ;;  %v1054_v31 = vmul.f32 %v2060_v8, %v2998_v48  ;;  %v2061_v51 = vld [vmem:[%s2659_s22] sm:$0xff] }
 0x3aa   : > { %1227 = vmatprep.mubr.f32.mxu0 %v1055_v45  ;;  %1346 = vst [vmem:[%s3007_s25 + $0xf8] sm:$0xff] %v1055_v45  ;;  %1345 = vst [vmem:[%s3007_s25 + $0xf0] sm:$0xff] %v1054_v31  ;;  %v2070_v45 = vld [vmem:[%s2659_s22 + $0x48] sm:$0xff] }
 0x3ab   : > { %1228 = vmatmul.mubr.f32.gmra.mxu0 %v1054_v31 }
 0x42f   : > { %v1727_v11 = vpop.f32.mrf.mxu0 }
 0x431   : > { %v1728_v16 = vpop.f32.mrf.mxu0 }
 0x432   : > { %v1729_v15 = vadd.f32 %v1728_v16, %v1727_v11 }
 0x433   : > { %v1730_v19 = vpop.f32.mrf.mxu0 }
 0x434   : > { %v1235_v7 = vmul.f32 %v1729_v15, %v3071_v18 }
 0x435   : > { %v1731_v17 = vpop.f32.mrf.mxu0 }
 0x436   : > { %v1732_v49 = vadd.f32 %v1731_v17, %v1730_v19  ;;  %v1251_v56 = vadd.f32 %v2061_v51, %v1235_v7  ;;  %v2071_v7 = vld [vmem:[%s2659_s22 + $0x50] sm:$0xff] }
 0x437   : > { %v1733_v48 = vpop.f32.mrf.mxu0 }
 0x438   : > { %v1236_v35 = vmul.f32 %v1732_v49, %v3071_v18  ;;  %1267 = vxpose.xlu0.b32.start [1/16] %v1251_v56, 128 }
 0x439   : > { %v1734_v50 = vpop.f32.mrf.mxu0 }
 0x43a   : > { %v1735_v26 = vadd.f32 %v1734_v50, %v1733_v48  ;;  %v1252_v10 = vadd.f32 %v2062_v9, %v1236_v35  ;;  %v2072_v35 = vld [vmem:[%s2659_s22 + $0x58] sm:$0xff] }
 0x43b   : > { %v1736_v61 = vpop.f32.mrf.mxu0 }
 0x43c   : > { %v1237_v40 = vmul.f32 %v1735_v26, %v3071_v18  ;;  %1268 = vxpose.xlu0.b32.cont [2/16] %v1252_v10, 128 }
 0x43d   : > { %v1737_v29 = vpop.f32.mrf.mxu0 }
 0x43e   : > { %v1738_v52 = vadd.f32 %v1737_v29, %v1736_v61  ;;  %v1253_v0 = vadd.f32 %v2063_v1, %v1237_v40  ;;  %v2073_v40 = vld [vmem:[%s2659_s22 + $0x60] sm:$0xff] }
 0x43f   : > { %v1739_v53 = vpop.f32.mrf.mxu0 }
 0x440   : > { %v1238_v32 = vmul.f32 %v1738_v52, %v3071_v18  ;;  %1269 = vxpose.xlu0.b32.cont [3/16] %v1253_v0, 128 }
 0x441   : > { %v1740_v57 = vpop.f32.mrf.mxu0 }
 0x442   : > { %v1741_v54 = vadd.f32 %v1740_v57, %v1739_v53  ;;  %v1254_v36 = vadd.f32 %v2064_v33, %v1238_v32  ;;  %v2074_v32 = vld [vmem:[%s2659_s22 + $0x68] sm:$0xff] }
 0x443   : > { %v1742_v23 = vpop.f32.mrf.mxu0 }
 0x444   : > { %v1239_v20 = vmul.f32 %v1741_v54, %v3071_v18  ;;  %1270 = vxpose.xlu0.b32.cont [4/16] %v1254_v36, 128 }
 0x445   : > { %v1743_v37 = vpop.f32.mrf.mxu0 }
 0x446   : > { %v1744_v38 = vadd.f32 %v1743_v37, %v1742_v23  ;;  %v1255_v34 = vadd.f32 %v2065_v55, %v1239_v20  ;;  %v2075_v20 = vld [vmem:[%s2659_s22 + $0x70] sm:$0xff]  ;;  %v2076_v55 = vld [vmem:[%s2659_s22 + $0x78] sm:$0xff]  ;;  %s2353_s22 = smov [#allocation12]  }
 0x447   : > { %v1745_v12 = vpop.f32.mrf.mxu0  ;;  %s2191_s17 = sshll.u32 %s2353_s22, 4  ;;  %s2192_s17 = int_to_ptr.vmem [resolvable:$false] %s2191_s17 }
 0x448   : > { %v1240_v13 = vmul.f32 %v1744_v38, %v3071_v18  ;;  %1271 = vxpose.xlu0.b32.cont [5/16] %v1255_v34, 128  ;;  %s2193_s4 = scalar_lea.vmem %s2192_s17, 8192  ;;  %p2194_p11 = scmp.lt.s32.totalorder %s3113_s26, %s2192_s17 }
 0x449   : > { %v1746_v43 = vpop.f32.mrf.mxu0  ;;  %p2195_p8 = scmp.lt.s32.totalorder %s2193_s4, %s2187_s9 }
 0x44a   : > { %v1747_v42 = vadd.f32 %v1746_v43, %v1745_v12  ;;  %v1256_v59 = vadd.f32 %v2066_v58, %v1240_v13 }
 0x44b   : > { %v1748_v63 = vpop.f32.mrf.mxu0  ;;  %p2196_p12 = por %p2195_p8, %p2194_p11 }
 0x44c   : > { %v1241_v60 = vmul.f32 %v1747_v42, %v3071_v18  ;;  %1272 = vxpose.xlu0.b32.cont [6/16] %v1256_v59, 128 }
 0x44d   : > { %v1749_v39 = vpop.f32.mrf.mxu0  ;;  %p2197_p3 = pnand %p2196_p12, %p2190_p1 }
 0x44e   : > { %v1750_v62 = vadd.f32 %v1749_v39, %v1748_v63  ;;  %v1257_v14 = vadd.f32 %v2067_v6, %v1241_v60 }
 0x44f   : > { %v1751_v30 = vpop.f32.mrf.mxu0 }
 0x450   : > { %v1242_v46 = vmul.f32 %v1750_v62, %v3071_v18  ;;  %1273 = vxpose.xlu0.b32.cont [7/16] %v1257_v14, 128 }
 0x451   : > { %v1752_v21 = vpop.f32.mrf.mxu0 }
 0x452   : > { %v1753_v22 = vadd.f32 %v1752_v21, %v1751_v30  ;;  %v1258_v3 = vadd.f32 %v2068_v47, %v1242_v46 }
 0x453   : > { %v1754_v24 = vpop.f32.mrf.mxu0 }
 0x454   : > { %v1243_v25 = vmul.f32 %v1753_v22, %v3071_v18  ;;  %1274 = vxpose.xlu0.b32.cont [8/16] %v1258_v3, 128 }
 0x455   : > { %v1755_v4 = vpop.f32.mrf.mxu0 }
 0x456   : > { %v1756_v28 = vadd.f32 %v1755_v4, %v1754_v24  ;;  %v1259_v2 = vadd.f32 %v2069_v27, %v1243_v25 }
 0x457   : > { %v1757_v5 = vpop.f32.mrf.mxu0 }
 0x458   : > { %v1244_v41 = vmul.f32 %v1756_v28, %v3071_v18  ;;  %1275 = vxpose.xlu0.b32.cont [9/16] %v1259_v2, 128 }
 0x459   : > { %v1758_v44 = vpop.f32.mrf.mxu0 }
 0x45a   : > { %v1759_v8 = vadd.f32 %v1758_v44, %v1757_v5  ;;  %v1260_v31 = vadd.f32 %v2070_v45, %v1244_v41 }
 0x45b   : > { %v1760_v11 = vpop.f32.mrf.mxu0 }
 0x45c   : > { %v1245_v16 = vmul.f32 %v1759_v8, %v3071_v18  ;;  %1276 = vxpose.xlu0.b32.cont [10/16] %v1260_v31, 128 }
 0x45d   : > { %v1761_v15 = vpop.f32.mrf.mxu0 }
 0x45e   : > { %v1762_v19 = vadd.f32 %v1761_v15, %v1760_v11  ;;  %v1261_v17 = vadd.f32 %v2071_v7, %v1245_v16 }
 0x45f   : > { %v1763_v49 = vpop.f32.mrf.mxu0 }
 0x460   : > { %v1246_v51 = vmul.f32 %v1762_v19, %v3071_v18  ;;  %1277 = vxpose.xlu0.b32.cont [11/16] %v1261_v17, 128 }
 0x461   : > { %v1764_v56 = vpop.f32.mrf.mxu0 }
 0x462   : > { %v1765_v48 = vadd.f32 %v1764_v56, %v1763_v49  ;;  %v1262_v50 = vadd.f32 %v2072_v35, %v1246_v51 }
 0x463   : > { %v1766_v26 = vpop.f32.mrf.mxu0 }
 0x464   : > { %v1247_v9 = vmul.f32 %v1765_v48, %v3071_v18  ;;  %1278 = vxpose.xlu0.b32.cont [12/16] %v1262_v50, 128 }
 0x465   : > { %v1767_v10 = vpop.f32.mrf.mxu0 }
 0x466   : > { %v1768_v61 = vadd.f32 %v1767_v10, %v1766_v26  ;;  %v1263_v29 = vadd.f32 %v2073_v40, %v1247_v9 }
 0x467   : > { %v1769_v52 = vpop.f32.mrf.mxu0 }
 0x468   : > { %v1248_v1 = vmul.f32 %v1768_v61, %v3071_v18  ;;  %1279 = vxpose.xlu0.b32.cont [13/16] %v1263_v29, 128 }
 0x469   : > { %v1770_v0 = vpop.f32.mrf.mxu0 }
 0x46a   : > { %v1771_v53 = vadd.f32 %v1770_v0, %v1769_v52  ;;  %v1264_v57 = vadd.f32 %v2074_v32, %v1248_v1 }
 0x46b   : > { %v1772_v54 = vpop.f32.mrf.mxu0 }
 0x46c   : > { %v1249_v33 = vmul.f32 %v1771_v53, %v3071_v18  ;;  %1280 = vxpose.xlu0.b32.cont [14/16] %v1264_v57, 128 }
 0x46d   : > { %v1773_v36 = vpop.f32.mrf.mxu0 }
 0x46e   : > { %v1774_v23 = vadd.f32 %v1773_v36, %v1772_v54  ;;  %v1265_v37 = vadd.f32 %v2075_v20, %v1249_v33 }
 0x470   : > { %v1250_v38 = vmul.f32 %v1774_v23, %v3071_v18  ;;  %1281 = vxpose.xlu0.b32.cont [15/16] %v1265_v37, 128 }
 0x472   : > { %v1266_v34 = vadd.f32 %v2076_v55, %v1250_v38 }
 0x474   : > { %1282 = vxpose.xlu0.b32.end [16/16] %v1266_v34, 128 }
 0x475   : > { %2200 = shalt.err (!%p2197_p3)
}
 0x476   : > { %s2201_s7 = scalar_lea.hbm %s3111_s6, 4096  ;;  %s2205_s21 = scalar_lea.hbm %s3316_s14, 16384 }
 0x477   : > { %p2202_p0 = scmp.ne.s32.totalorder %s3111_s6, %s2201_s7  ;;  %p2206_p4 = scmp.lt.s32.totalorder %s3111_s6, %s3316_s14 }
 0x478   : > { %p2207_p5 = scmp.lt.s32.totalorder %s2205_s21, %s2201_s7 }
 0x479   : > { %p2203_p6 = pnand %p2202_p0, %p3317_p2 }
 0x47a   : > { %p2208_p7 = por %p2207_p5, %p2206_p4 }
 0x47b   : > { %p2204_p9 = pneg %p2203_p6 }
 0x47d   : > { %p2209_p10 = pnand %p2208_p7, %p2204_p9 }
 0x47f   : > { %2212 = shalt.err (!%p2209_p10)
}
 0x480   : > { %s2354_s27 = smov 256   ;;  %s2355_s23 = smov 16  }
 0x481   : > { %1842 = dma.vmem_to_hbm [thread:$0]  (%p3317_p2), %s3113_s26, 4096, %s3111_s6, %s1353_s3, %s2354_s27, %s2354_s27, %s2355_s23  }
 0x482   : > { %s3142_s20 = scalar_lea.vmem [#allocation11], %s1579_s16  ;;  %s1588_s16 = sshll.u32 %s3314_s24, 5 }
 0x483   : > { %s1364_s26 = sadd.s32 %s3313_s19, %s1588_s16  ;;  %s1367_s6 = sshll.u32 %s3142_s20, 4  ;;  %s3167_s6 = int_to_ptr.vmem [resolvable:$true] %s1367_s6 }
 0x484   : > { %s1589_s1 = sshll.u32 %s1364_s26, 7  ;;  %s3318_s22 = sld [smem:[#allocation34_spill]] }
 0x485   : > { %s1348_s24 = scalar_lea.sflag [#allocation5], %s2653_s13  ;;  %s2213_s4 = scalar_lea.vmem %s3167_s6, 2048 }
 0x486   : > { %p2214_p13 = scmp.ne.s32.totalorder %s3167_s6, %s2213_s4  ;;  %s2356_s19 = smov [#allocation11]  }
 0x487   : > { %s2217_s7 = sshll.u32 %s2356_s19, 4  ;;  %s2218_s7 = int_to_ptr.vmem [resolvable:$false] %s2217_s7 }
 0x488   : > { %p2215_p1 = pnand %p2214_p13, %p3317_p2  ;;  %s2219_s15 = scalar_lea.vmem %s2218_s7, 4096 }
 0x489   : > { %p2220_p8 = scmp.lt.s32.totalorder %s3167_s6, %s2218_s7  ;;  %p2221_p12 = scmp.lt.s32.totalorder %s2219_s15, %s2213_s4 }
 0x48a   : > { %s3165_s17 = scalar_lea.hbm %s3318_s22, %s1589_s1  ;;  %p2216_p11 = pneg %p2215_p1 }
 0x48b   : > { %p2222_p3 = por %p2221_p12, %p2220_p8 }
 0x48d   : > { %p2223_p0 = pnand %p2222_p3, %p2216_p11 }
 0x4b4   : > { %v1283_v18 = vpop.trf.xlu0 }
 0x4b5   : > { %1299 = vst [vmem:[%s3142_s20] sm:$0xff] %v1283_v18 }
 0x4b8   : > { %v1284_v12 = vpop.trf.xlu0 }
 0x4b9   : > { %1300 = vst [vmem:[%s3142_s20 + $0x8] sm:$0xff] %v1284_v12 }
 0x4bc   : > { %v1285_v13 = vpop.trf.xlu0 }
 0x4bd   : > { %1301 = vst [vmem:[%s3142_s20 + $0x10] sm:$0xff] %v1285_v13 }
 0x4c0   : > { %v1286_v43 = vpop.trf.xlu0 }
 0x4c1   : > { %1302 = vst [vmem:[%s3142_s20 + $0x18] sm:$0xff] %v1286_v43 }
 0x4c4   : > { %v1287_v42 = vpop.trf.xlu0 }
 0x4c5   : > { %1303 = vst [vmem:[%s3142_s20 + $0x20] sm:$0xff] %v1287_v42 }
 0x4c8   : > { %v1288_v58 = vpop.trf.xlu0 }
 0x4c9   : > { %1304 = vst [vmem:[%s3142_s20 + $0x28] sm:$0xff] %v1288_v58 }
 0x4cc   : > { %v1289_v59 = vpop.trf.xlu0 }
 0x4cd   : > { %1305 = vst [vmem:[%s3142_s20 + $0x30] sm:$0xff] %v1289_v59 }
 0x4d0   : > { %v1290_v63 = vpop.trf.xlu0 }
 0x4d1   : > { %1306 = vst [vmem:[%s3142_s20 + $0x38] sm:$0xff] %v1290_v63 }
 0x4d4   : > { %v1291_v60 = vpop.trf.xlu0 }
 0x4d5   : > { %1307 = vst [vmem:[%s3142_s20 + $0x40] sm:$0xff] %v1291_v60 }
 0x4d8   : > { %v1292_v39 = vpop.trf.xlu0 }
 0x4d9   : > { %1308 = vst [vmem:[%s3142_s20 + $0x48] sm:$0xff] %v1292_v39 }
 0x4dc   : > { %v1293_v62 = vpop.trf.xlu0 }
 0x4dd   : > { %1309 = vst [vmem:[%s3142_s20 + $0x50] sm:$0xff] %v1293_v62 }
 0x4e0   : > { %v1294_v6 = vpop.trf.xlu0 }
 0x4e1   : > { %1310 = vst [vmem:[%s3142_s20 + $0x58] sm:$0xff] %v1294_v6 }
 0x4e4   : > { %v1295_v14 = vpop.trf.xlu0 }
 0x4e5   : > { %1311 = vst [vmem:[%s3142_s20 + $0x60] sm:$0xff] %v1295_v14 }
 0x4e8   : > { %v1296_v30 = vpop.trf.xlu0 }
 0x4e9   : > { %1312 = vst [vmem:[%s3142_s20 + $0x68] sm:$0xff] %v1296_v30 }
 0x4ec   : > { %v1297_v46 = vpop.trf.xlu0 }
 0x4ed   : > { %1313 = vst [vmem:[%s3142_s20 + $0x70] sm:$0xff] %v1297_v46 }
 0x4f0   : > { %v1298_v21 = vpop.trf.xlu0 }
 0x4f1   : > { %1314 = vst [vmem:[%s3142_s20 + $0x78] sm:$0xff] %v1298_v21 }
 0x4f2   : > { %2226 = shalt.err (!%p2223_p0)
}
 0x4f3   : > { %s2227_s25 = scalar_lea.hbm %s3165_s17, 2048  ;;  %s2231_s18 = scalar_lea.hbm %s3318_s22, 8192 }
 0x4f4   : > { %p2228_p6 = scmp.ne.s32.totalorder %s3165_s17, %s2227_s25  ;;  %p2232_p5 = scmp.lt.s32.totalorder %s3165_s17, %s3318_s22 }
 0x4f5   : > { %p2233_p7 = scmp.lt.s32.totalorder %s2231_s18, %s2227_s25 }
 0x4f6   : > { %p2229_p9 = pnand %p2228_p6, %p3317_p2 }
 0x4f7   : > { %p2234_p10 = por %p2233_p7, %p2232_p5 }
 0x4f8   : > { %p2230_p4 = pneg %p2229_p9 }
 0x4fa   : > { %p2235_p13 = pnand %p2234_p10, %p2230_p4 }
 0x4fc   : > { %2238 = shalt.err (!%p2235_p13)
}
 0x4fd   : > { %s2357_s16 = smov 128   ;;  %s2358_s26 = smov 8  }
 0x4fe   : > { %1841 = dma.vmem_to_hbm [thread:$0]  (%p3317_p2), %s3167_s6, 2048, %s3165_s17, %s1348_s24, %s2357_s16, %s2354_s27, %s2358_s26  }
 0x4ff PF: > { %s3319_s1 = sld [smem:[#allocation20_spill]]  ;;  %p1869_p1 = scmp.ge.s32.totalorder %s2345_s12, 2 }
 0x500   : > { %s3320_s3 = sld [smem:[#allocation26_spill]] }
 0x505   : > { %s1401_s9 = sand.u32 1, %s3319_s1  }
 0x506   : > { %p3321_p11 = scmp.ne.s32.totalorder %s3320_s3, 0  ;;  %s1402_s4 = scalar_lea.sflag [#allocation5], %s1401_s9 }
 0x508   : > { %p1860_p8 = pnand %p1869_p1, %p3321_p11 }
 0x50a   : > { %p1861_p12 = pneg %p1860_p8 }
 0x50c   : > { %2296 = dma.done.wait (%p1861_p12), %s1402_s4, 2048  }
 0x50d   : > { %2298 = vsyncadd (%p1861_p12), %s1402_s4, 4294965248  ;;  %s1411_s19 = scalar_lea.sflag [#allocation13], %s1401_s9 }
 0x50e   : > { %2300 = dma.done.wait (%p1861_p12), %s1411_s19, 4096  }
 0x50f   : > { %2302 = vsyncadd (%p1861_p12), %s1411_s19, 4294963200  ;;  %s32_s12 = sadd.s32 1, %s2345_s12   ;;  %s3322_s26 = sld [smem:[#allocation19_spill]] }
 0x510   : > { %p29_p3 = scmp.ge.s32.totalorder %s32_s12, 6   ;;  %s3323_s13 = sld [smem:[#allocation23_spill]] }
 0x511   : > { %s3324_s2 = sld [smem:[#allocation27_spill]]  ;;  %s3326_s27 = smov %s2313_s28 }
 0x512   : > { %s3325_s6 = sld [smem:[#allocation29_spill]]  ;;  %s3327_s28 = smov %s2600_s8 }
 0x513   : > { %s3328_s29 = smov %s2321_s30  ;;  %s3329_s30 = smov %s2325_s5 }
 0x514   : > { %s3330_s5 = smov %s2605_s10  ;;  %s3332_s9 = smov %s2341_s11 }
 0x515   :  { %31 = sbr.rel (!%p29_p3) target bundleno = 22 (0x16), region = 134 }
 0x516   : > { %s3331_s8 = smov %s3323_s13 }
 0x517   : > { %s3333_s10 = smov %s3324_s2 }
 0x518   : > { %s3334_s11 = smov %s3325_s6 }
 0x51a   :  { %1416 = vsyncpa [#allocation4], 1 }
 0x51b   :  { %1418 = vsyncpa [#allocation4 + $0x1], 1 }
 0x51c   :  { %1419 = vsyncpa [#allocation7], 1 }
 0x51d   :  { %1421 = vsyncpa [#allocation7 + $0x1], 1 }
 0x51e   :  { %1422 = vsyncpa [#allocation10], 1 }
 0x51f   :  { %1423 = vsyncpa [#allocation5], 1 }
 0x520   :  { %1425 = vsyncpa [#allocation5 + $0x1], 1 }
 0x521   :  { %1426 = vsyncpa [#allocation13], 1 }
 0x522   :  { %1428 = vsyncpa [#allocation13 + $0x1], 1 }

</bundles_post_ra>
